<compile_context>
chip_gen: v7x
topology: tpu7x:2x2x1
jax: 0.10.0
libtpu: 0.0.40
codegen_flags: <defaults>
</compile_context>

<pallas_src>
import numpy as np
import jax
import jax.numpy as jnp
from jax.experimental import pallas as pl
from jax.experimental.pallas import tpu as pltpu

NEG = -1e30  # plain Python float stand-in for -inf (NOT a jnp constant -> nothing is captured)


def _round_up(x, m):
    return (x + m - 1) // m * m


def _make_ctc_kernel(block_t):
    """Build the kernel body; block_t = static number of frames handled per grid step."""

    def kernel(logp_ref, onehot_ref, allow_ref, inlen_ref, tgtlen_ref, valid_ref,
               out_ref, alpha_ref):
        # logp_ref   : (NB, tT, C) f32  log-prob tile (streamed over T)
        # onehot_ref : (NB, L,  C) f32  one-hot of extended target [b, y1, b, ..., yS, b] (resident)
        # allow_ref  : (NB, L)     f32  1.0 where the CTC skip transition s-2 -> s is legal
        # inlen_ref  : (NB, 1)     i32  cqt_lens
        # tgtlen_ref : (NB, 1)     i32  token_lens_gt
        # valid_ref  : (NB, 1)     f32  1.0 for real batch rows, 0.0 for padding rows
        # out_ref    : (NB, 1)     f32  per-row nll / target_len  (written on the last T step)
        # alpha_ref  : (NB, L)     f32  forward variables, persist across T grid steps
        NB, L = alpha_ref.shape
        tb = pl.program_id(1)
        nt = pl.num_programs(1)

        s_iota = jax.lax.broadcasted_iota(jnp.int32, (NB, L), 1)
        mask1 = s_iota >= 1                                          # loop-invariant
        mask2 = jnp.logical_and(s_iota >= 2, allow_ref[...] > 0.5)   # loop-invariant

        # One MXU contraction per tile: tlp[n, t, s] = logp[n, t, ext[n, s]]
        tlp = jax.lax.dot_general(
            logp_ref[...], onehot_ref[...],
            dimension_numbers=(((2,), (2,)), ((0,), (0,))),
            preferred_element_type=jnp.float32)                      # (NB, tT, L)

        @pl.when(tb == 0)
        def _init():
            # t = 0: alpha[s] = logp(l'_s) for s < 2, else -inf
            alpha_ref[...] = jnp.where(s_iota < 2, tlp[:, 0, :], NEG)

        inlen = inlen_ref[...]                                       # (NB, 1)

        def lse3(a, b, c):
            # log(e^a + e^b + e^c) with only two exps: the max contributes exactly 1.
            hi = jnp.maximum(a, b)
            lo = jnp.minimum(a, b)
            m = jnp.maximum(hi, c)
            mid = jnp.minimum(hi, c)
            return m + jnp.log(1.0 + jnp.exp(mid - m) + jnp.exp(lo - m))

        alpha = alpha_ref[...]
        t_base = tb * block_t
        for j in range(block_t):                                     # static unroll over frames
            tlp_t = tlp[:, j, :]                                     # (NB, L), static slice
            a1 = jnp.where(mask1, pltpu.roll(alpha, shift=1, axis=1), NEG)   # alpha[s-1]
            a2 = jnp.where(mask2, pltpu.roll(alpha, shift=2, axis=1), NEG)   # alpha[s-2] (legal skips)
            new = lse3(alpha, a1, a2) + tlp_t
            t_glob = t_base + j
            # skip the already-initialised frame 0 and freeze rows whose input is exhausted
            upd = jnp.logical_and(t_glob >= 1, t_glob < inlen)
            alpha = jnp.where(upd, new, alpha)
        alpha_ref[...] = alpha

        @pl.when(tb == nt - 1)
        def _finalize():
            tgtlen = tgtlen_ref[...]                                 # (NB, 1)
            lv = 2 * tgtlen + 1
            fin = jnp.logical_or(
                s_iota == lv - 1,
                jnp.logical_and(s_iota == lv - 2, tgtlen >= 1))
            af = jnp.where(fin, alpha, NEG)
            m = jnp.max(af, axis=1, keepdims=True)
            lse = m + jnp.log(jnp.sum(jnp.exp(af - m), axis=1, keepdims=True))
            nll = -lse
            nll = jnp.where(nll > 1e29, 0.0, nll)                    # zero_infinity=True
            denom = jnp.maximum(tgtlen, 1).astype(jnp.float32)       # reduction='mean' per-sample
            out_ref[...] = (nll / denom) * valid_ref[...]

    return kernel


def ctc_loss_pallas(preds_logprob, tokens_gt, cqt_lens, token_lens_gt,
                    blank=0, block_t=32, block_n=8):
    """Forward of CTCLoss(blank=0, reduction='mean', zero_infinity=True).

    preds_logprob: (N, T, C) log-probabilities (batch-major, as fed to the torch module)
    tokens_gt:     (N, S) int padded targets
    cqt_lens:      (N,) int input lengths
    token_lens_gt: (N,) int target lengths

    Note: the module's mask_by_length + swapaxes are no-ops for the CTC value (CTC only reads
    frames t < cqt_lens); neither a transpose nor a frame mask is materialised here.
    """
    assert block_n % 8 == 0 and block_t % 8 == 0
    N, T, C = preds_logprob.shape
    S = tokens_gt.shape[1]

    NB = block_n
    tT = min(block_t, _round_up(T, 8))
    N_pad = _round_up(N, NB)
    T_pad = _round_up(T, tT)
    C_pad = _round_up(C, 128)
    L = 2 * S + 1
    L_pad = _round_up(L, 128)

    # --- glue: padding + extended target encoding -------------------------------------------
    logp = jnp.pad(jnp.asarray(preds_logprob, jnp.float32),
                   ((0, N_pad - N), (0, T_pad - T), (0, C_pad - C)))
    tokens = jnp.pad(jnp.asarray(tokens_gt, jnp.int32),
                     ((0, N_pad - N), (0, 0)), constant_values=blank)

    ext = jnp.full((N_pad, L_pad), blank, jnp.int32)
    ext = ext.at[:, 1:2 * S:2].set(tokens)                 # [b, y1, b, y2, ..., yS, b, pad...]
    onehot = jax.nn.one_hot(ext, C_pad, dtype=jnp.float32)

    ext_m2 = jnp.concatenate([jnp.full((N_pad, 2), -1, jnp.int32), ext[:, :-2]], axis=1)
    s_idx = jnp.arange(L_pad, dtype=jnp.int32)[None, :]
    allow = ((s_idx >= 2) & (ext != blank) & (ext != ext_m2)).astype(jnp.float32)

    inlen = jnp.pad(jnp.asarray(cqt_lens, jnp.int32), (0, N_pad - N)).reshape(N_pad, 1)
    tgtlen = jnp.pad(jnp.asarray(token_lens_gt, jnp.int32), (0, N_pad - N)).reshape(N_pad, 1)
    valid = (jnp.arange(N_pad) < N).astype(jnp.float32).reshape(N_pad, 1)

    # TODO(synk): rows with cqt_lens == 0 (degenerate empty inputs) are not special-cased to
    # reproduce torch's inf -> 0 behaviour exactly.

    grid = (N_pad // NB, T_pad // tT)
    per_row = pl.pallas_call(
        _make_ctc_kernel(tT),
        out_shape=jax.ShapeDtypeStruct((N_pad, 1), jnp.float32),
        grid_spec=pltpu.PrefetchScalarGridSpec(
            num_scalar_prefetch=0,
            grid=grid,
            in_specs=[
                pl.BlockSpec((NB, tT, C_pad), lambda n, t: (n, t, 0)),     # streamed over T
                pl.BlockSpec((NB, L_pad, C_pad), lambda n, t: (n, 0, 0)),  # resident per N-block
                pl.BlockSpec((NB, L_pad), lambda n, t: (n, 0)),
                pl.BlockSpec((NB, 1), lambda n, t: (n, 0)),
                pl.BlockSpec((NB, 1), lambda n, t: (n, 0)),
                pl.BlockSpec((NB, 1), lambda n, t: (n, 0)),
            ],
            out_specs=pl.BlockSpec((NB, 1), lambda n, t: (n, 0)),
            scratch_shapes=[pltpu.VMEM((NB, L_pad), jnp.float32)],         # alpha carry
        ),
        compiler_params=pltpu.CompilerParams(
            dimension_semantics=("parallel", "arbitrary"),
            vmem_limit_bytes=64 * 1024 * 1024),
    )(logp, onehot, allow, inlen, tgtlen, valid)

    return jnp.sum(per_row) / jnp.float32(N)


def _ctc_ref(logprob, tokens, in_lens, tgt_lens, blank=0):
    """Pure numpy reference (same semantics as torch.nn.CTCLoss, mean, zero_infinity)."""
    logprob = np.asarray(logprob, np.float64)
    N = logprob.shape[0]
    per = []
    for n in range(N):
        T, S = int(in_lens[n]), int(tgt_lens[n])
        ext = [blank]
        for k in range(S):
            ext += [int(tokens[n, k]), blank]
        L = len(ext)
        lp = logprob[n]
        alpha = np.full(L, -np.inf)
        alpha[0] = lp[0, blank]
        if L > 1:
            alpha[1] = lp[0, ext[1]]
        for t in range(1, T):
            new = np.full(L, -np.inf)
            for s in range(L):
                v = alpha[s]
                if s >= 1:
                    v = np.logaddexp(v, alpha[s - 1])
                if s >= 2 and ext[s] != blank and ext[s] != ext[s - 2]:
                    v = np.logaddexp(v, alpha[s - 2])
                new[s] = v + lp[t, ext[s]]
            alpha = new
        ll = alpha[L - 1]
        if L >= 2:
            ll = np.logaddexp(ll, alpha[L - 2])
        nll = -ll
        if not np.isfinite(nll):
            nll = 0.0
        per.append(nll / max(S, 1))
    return float(np.mean(per))


if __name__ == "__main__":
    key = jax.random.PRNGKey(0)
    k1, k2 = jax.random.split(key)
    N, T, C, S = 2, 16, 8, 5

    logits = jax.random.normal(k1, (N, T, C), jnp.float32)
    preds_logprob = jax.nn.log_softmax(logits, axis=-1)                  # module expects log-probs
    tokens_gt = jax.random.randint(k2, (N, S), 1, C).astype(jnp.int32)   # labels in [1, C-1]
    cqt_lens = jnp.array([16, 12], jnp.int32)
    token_lens_gt = jnp.array([5, 3], jnp.int32)

    loss = ctc_loss_pallas(preds_logprob, tokens_gt, cqt_lens, token_lens_gt, block_t=8)
    loss = jax.block_until_ready(loss)

    ref = _ctc_ref(np.asarray(preds_logprob), np.asarray(tokens_gt),
                   np.asarray(cqt_lens), np.asarray(token_lens_gt))
    np.testing.assert_allclose(float(loss), ref, rtol=2e-3, atol=2e-3)
    print("KERNEL_OK")
</pallas_src>

<mosaic_0001>
module attributes {stable_mosaic.version = 11 : i64} {
  func.func @kernel(%arg0: i32, %arg1: i32, %arg2: memref<8x8x128xf32, #tpu.memory_space<vmem>>, %arg3: memref<8x128x128xf32, #tpu.memory_space<vmem>>, %arg4: memref<8x128xf32, #tpu.memory_space<vmem>>, %arg5: memref<8x1xi32, #tpu.memory_space<vmem>>, %arg6: memref<8x1xi32, #tpu.memory_space<vmem>>, %arg7: memref<8x1xf32, #tpu.memory_space<vmem>>, %arg8: memref<8x1xf32, #tpu.memory_space<vmem>>, %arg9: memref<8x128xf32, #tpu.memory_space<vmem>>) attributes {dimension_semantics = [#tpu.dimension_semantics<parallel>, #tpu.dimension_semantics<arbitrary>], iteration_bounds = array<i64: 1, 2>, scalar_prefetch = 0 : i64, scratch_operands = 1 : i64, tpu.core_type = #tpu.core_type<tc>, window_params = [{transform_indices = @transform_0, window_bounds = array<i64: 8, 8, 128>}, {transform_indices = @transform_1, window_bounds = array<i64: 8, 128, 128>}, {transform_indices = @transform_2, window_bounds = array<i64: 8, 128>}, {transform_indices = @transform_3, window_bounds = array<i64: 8, 1>}, {transform_indices = @transform_4, window_bounds = array<i64: 8, 1>}, {transform_indices = @transform_5, window_bounds = array<i64: 8, 1>}, {transform_indices = @transform_6, window_bounds = array<i64: 8, 1>}]} {
    %0 = tpu.iota {dimensions = array<i32: 1>} : vector<8x128xi32>
    %c1_i32 = arith.constant 1 : i32
    %1 = vector.broadcast %c1_i32 : i32 to vector<8x128xi32>
    %2 = arith.cmpi sge, %0, %1 : vector<8x128xi32>
    %c2_i32 = arith.constant 2 : i32
    %3 = vector.broadcast %c2_i32 : i32 to vector<8x128xi32>
    %4 = arith.cmpi sge, %0, %3 : vector<8x128xi32>
    %c0 = arith.constant 0 : index
    %c0_0 = arith.constant 0 : index
    %5 = vector.load %arg4[%c0, %c0_0] : memref<8x128xf32, #tpu.memory_space<vmem>>, vector<8x128xf32>
    %cst = arith.constant 5.000000e-01 : f32
    %6 = vector.broadcast %cst : f32 to vector<8x128xf32>
    %7 = arith.cmpf ogt, %5, %6 : vector<8x128xf32>
    %8 = arith.andi %4, %7 : vector<8x128xi1>
    %c0_1 = arith.constant 0 : index
    %c0_2 = arith.constant 0 : index
    %c0_3 = arith.constant 0 : index
    %9 = vector.load %arg2[%c0_1, %c0_2, %c0_3] : memref<8x8x128xf32, #tpu.memory_space<vmem>>, vector<8x8x128xf32>
    %c0_4 = arith.constant 0 : index
    %c0_5 = arith.constant 0 : index
    %c0_6 = arith.constant 0 : index
    %10 = vector.load %arg3[%c0_4, %c0_5, %c0_6] : memref<8x128x128xf32, #tpu.memory_space<vmem>>, vector<8x128x128xf32>
    %cst_7 = arith.constant dense<0.000000e+00> : vector<8x8x128xf32>
    %11 = tpu.matmul %9, %10, %cst_7 {dimension_numbers = #tpu.dot_dimension_numbers<[2], [2], [1], [1], [0, 0, 0, 1, 1, 1], [0], [0]>} : vector<8x8x128xf32>, vector<8x128x128xf32>, vector<8x8x128xf32> -> vector<8x8x128xf32>
    %c0_i32 = arith.constant 0 : i32
    %12 = arith.cmpi eq, %arg1, %c0_i32 : i32
    %13 = arith.extui %12 : i1 to i32
    %c0_i32_8 = arith.constant 0 : i32
    %14 = arith.cmpi ne, %13, %c0_i32_8 : i32
    scf.if %14 {
      %c2_i32_68 = arith.constant 2 : i32
      %270 = vector.broadcast %c2_i32_68 : i32 to vector<8x128xi32>
      %271 = arith.cmpi slt, %0, %270 : vector<8x128xi32>
      %272 = vector.extract_strided_slice %11 {offsets = [0, 0, 0], sizes = [8, 1, 128], strides = [1, 1, 1]} : vector<8x8x128xf32> to vector<8x1x128xf32>
      %273 = vector.shape_cast %272 : vector<8x1x128xf32> to vector<8x128xf32>
      %cst_69 = arith.constant -1.000000e+30 : f32
      %274 = vector.broadcast %cst_69 : f32 to vector<8x128xf32>
      %275 = arith.select %271, %273, %274 : vector<8x128xi1>, vector<8x128xf32>
      %c0_70 = arith.constant 0 : index
      %c0_71 = arith.constant 0 : index
      %276 = vector.load %arg9[%c0_70, %c0_71] : memref<8x128xf32, #tpu.memory_space<vmem>>, vector<8x128xf32>
      tpu.vector_store %arg9[%c0_70, %c0_71], %275 {strides = array<i32>} : memref<8x128xf32, #tpu.memory_space<vmem>>, vector<8x128xf32>,
    } else {
    }
    %c0_9 = arith.constant 0 : index
    %c0_10 = arith.constant 0 : index
    %15 = vector.load %arg5[%c0_9, %c0_10] : memref<8x1xi32, #tpu.memory_space<vmem>>, vector<8x1xi32>
    %c0_11 = arith.constant 0 : index
    %c0_12 = arith.constant 0 : index
    %16 = vector.load %arg9[%c0_11, %c0_12] : memref<8x128xf32, #tpu.memory_space<vmem>>, vector<8x128xf32>
    %c8_i32 = arith.constant 8 : i32
    %17 = arith.muli %arg1, %c8_i32 : i32
    %18 = vector.extract_strided_slice %11 {offsets = [0, 0, 0], sizes = [8, 1, 128], strides = [1, 1, 1]} : vector<8x8x128xf32> to vector<8x1x128xf32>
    %19 = vector.shape_cast %18 : vector<8x1x128xf32> to vector<8x128xf32>
    %c1_i32_13 = arith.constant 1 : i32
    %20 = tpu.dynamic_rotate %16 by %c1_i32_13 dim 1 : vector<8x128xf32>, i32 -> vector<8x128xf32>
    %cst_14 = arith.constant -1.000000e+30 : f32
    %21 = vector.broadcast %cst_14 : f32 to vector<8x128xf32>
    %22 = arith.select %2, %20, %21 : vector<8x128xi1>, vector<8x128xf32>
    %c2_i32_15 = arith.constant 2 : i32
    %23 = tpu.dynamic_rotate %16 by %c2_i32_15 dim 1 : vector<8x128xf32>, i32 -> vector<8x128xf32>
    %cst_16 = arith.constant -1.000000e+30 : f32
    %24 = vector.broadcast %cst_16 : f32 to vector<8x128xf32>
    %25 = arith.select %8, %23, %24 : vector<8x128xi1>, vector<8x128xf32>
    %26 = arith.maximumf %16, %22 : vector<8x128xf32>
    %27 = arith.minimumf %16, %22 : vector<8x128xf32>
    %28 = arith.maximumf %26, %25 : vector<8x128xf32>
    %29 = arith.minimumf %26, %25 : vector<8x128xf32>
    %30 = arith.subf %29, %28 : vector<8x128xf32>
    %31 = math.exp %30 : vector<8x128xf32>
    %cst_17 = arith.constant 1.000000e+00 : f32
    %32 = vector.broadcast %cst_17 : f32 to vector<8x128xf32>
    %33 = arith.addf %32, %31 : vector<8x128xf32>
    %34 = arith.subf %27, %28 : vector<8x128xf32>
    %35 = math.exp %34 : vector<8x128xf32>
    %36 = arith.addf %33, %35 : vector<8x128xf32>
    %37 = math.log %36 : vector<8x128xf32>
    %38 = arith.addf %28, %37 : vector<8x128xf32>
    %39 = arith.addf %38, %19 : vector<8x128xf32>
    %c0_i32_18 = arith.constant 0 : i32
    %40 = arith.addi %17, %c0_i32_18 : i32
    %c1_i32_19 = arith.constant 1 : i32
    %41 = arith.cmpi sge, %40, %c1_i32_19 : i32
    %42 = vector.broadcast %40 : i32 to vector<8x1xi32>
    %43 = arith.cmpi slt, %42, %15 : vector<8x1xi32>
    %44 = vector.broadcast %41 : i1 to vector<8x1xi1>
    %45 = arith.andi %44, %43 : vector<8x1xi1>
    %46 = vector.shape_cast %45 : vector<8x1xi1> to vector<8x1xi1>
    %47 = vector.broadcast %46 : vector<8x1xi1> to vector<8x128xi1>
    %48 = arith.select %47, %39, %16 : vector<8x128xi1>, vector<8x128xf32>
    %49 = vector.extract_strided_slice %11 {offsets = [0, 1, 0], sizes = [8, 1, 128], strides = [1, 1, 1]} : vector<8x8x128xf32> to vector<8x1x128xf32>
    %50 = vector.shape_cast %49 : vector<8x1x128xf32> to vector<8x128xf32>
    %c1_i32_20 = arith.constant 1 : i32
    %51 = tpu.dynamic_rotate %48 by %c1_i32_20 dim 1 : vector<8x128xf32>, i32 -> vector<8x128xf32>
    %cst_21 = arith.constant -1.000000e+30 : f32
    %52 = vector.broadcast %cst_21 : f32 to vector<8x128xf32>
    %53 = arith.select %2, %51, %52 : vector<8x128xi1>, vector<8x128xf32>
    %c2_i32_22 = arith.constant 2 : i32
    %54 = tpu.dynamic_rotate %48 by %c2_i32_22 dim 1 : vector<8x128xf32>, i32 -> vector<8x128xf32>
    %cst_23 = arith.constant -1.000000e+30 : f32
    %55 = vector.broadcast %cst_23 : f32 to vector<8x128xf32>
    %56 = arith.select %8, %54, %55 : vector<8x128xi1>, vector<8x128xf32>
    %57 = arith.maximumf %48, %53 : vector<8x128xf32>
    %58 = arith.minimumf %48, %53 : vector<8x128xf32>
    %59 = arith.maximumf %57, %56 : vector<8x128xf32>
    %60 = arith.minimumf %57, %56 : vector<8x128xf32>
    %61 = arith.subf %60, %59 : vector<8x128xf32>
    %62 = math.exp %61 : vector<8x128xf32>
    %cst_24 = arith.constant 1.000000e+00 : f32
    %63 = vector.broadcast %cst_24 : f32 to vector<8x128xf32>
    %64 = arith.addf %63, %62 : vector<8x128xf32>
    %65 = arith.subf %58, %59 : vector<8x128xf32>
    %66 = math.exp %65 : vector<8x128xf32>
    %67 = arith.addf %64, %66 : vector<8x128xf32>
    %68 = math.log %67 : vector<8x128xf32>
    %69 = arith.addf %59, %68 : vector<8x128xf32>
    %70 = arith.addf %69, %50 : vector<8x128xf32>
    %c1_i32_25 = arith.constant 1 : i32
    %71 = arith.addi %17, %c1_i32_25 : i32
    %c1_i32_26 = arith.constant 1 : i32
    %72 = arith.cmpi sge, %71, %c1_i32_26 : i32
    %73 = vector.broadcast %71 : i32 to vector<8x1xi32>
    %74 = arith.cmpi slt, %73, %15 : vector<8x1xi32>
    %75 = vector.broadcast %72 : i1 to vector<8x1xi1>
    %76 = arith.andi %75, %74 : vector<8x1xi1>
    %77 = vector.shape_cast %76 : vector<8x1xi1> to vector<8x1xi1>
    %78 = vector.broadcast %77 : vector<8x1xi1> to vector<8x128xi1>
    %79 = arith.select %78, %70, %48 : vector<8x128xi1>, vector<8x128xf32>
    %80 = vector.extract_strided_slice %11 {offsets = [0, 2, 0], sizes = [8, 1, 128], strides = [1, 1, 1]} : vector<8x8x128xf32> to vector<8x1x128xf32>
    %81 = vector.shape_cast %80 : vector<8x1x128xf32> to vector<8x128xf32>
    %c1_i32_27 = arith.constant 1 : i32
    %82 = tpu.dynamic_rotate %79 by %c1_i32_27 dim 1 : vector<8x128xf32>, i32 -> vector<8x128xf32>
    %cst_28 = arith.constant -1.000000e+30 : f32
    %83 = vector.broadcast %cst_28 : f32 to vector<8x128xf32>
    %84 = arith.select %2, %82, %83 : vector<8x128xi1>, vector<8x128xf32>
    %c2_i32_29 = arith.constant 2 : i32
    %85 = tpu.dynamic_rotate %79 by %c2_i32_29 dim 1 : vector<8x128xf32>, i32 -> vector<8x128xf32>
    %cst_30 = arith.constant -1.000000e+30 : f32
    %86 = vector.broadcast %cst_30 : f32 to vector<8x128xf32>
    %87 = arith.select %8, %85, %86 : vector<8x128xi1>, vector<8x128xf32>
    %88 = arith.maximumf %79, %84 : vector<8x128xf32>
    %89 = arith.minimumf %79, %84 : vector<8x128xf32>
    %90 = arith.maximumf %88, %87 : vector<8x128xf32>
    %91 = arith.minimumf %88, %87 : vector<8x128xf32>
    %92 = arith.subf %91, %90 : vector<8x128xf32>
    %93 = math.exp %92 : vector<8x128xf32>
    %cst_31 = arith.constant 1.000000e+00 : f32
    %94 = vector.broadcast %cst_31 : f32 to vector<8x128xf32>
    %95 = arith.addf %94, %93 : vector<8x128xf32>
    %96 = arith.subf %89, %90 : vector<8x128xf32>
    %97 = math.exp %96 : vector<8x128xf32>
    %98 = arith.addf %95, %97 : vector<8x128xf32>
    %99 = math.log %98 : vector<8x128xf32>
    %100 = arith.addf %90, %99 : vector<8x128xf32>
    %101 = arith.addf %100, %81 : vector<8x128xf32>
    %c2_i32_32 = arith.constant 2 : i32
    %102 = arith.addi %17, %c2_i32_32 : i32
    %c1_i32_33 = arith.constant 1 : i32
    %103 = arith.cmpi sge, %102, %c1_i32_33 : i32
    %104 = vector.broadcast %102 : i32 to vector<8x1xi32>
    %105 = arith.cmpi slt, %104, %15 : vector<8x1xi32>
    %106 = vector.broadcast %103 : i1 to vector<8x1xi1>
    %107 = arith.andi %106, %105 : vector<8x1xi1>
    %108 = vector.shape_cast %107 : vector<8x1xi1> to vector<8x1xi1>
    %109 = vector.broadcast %108 : vector<8x1xi1> to vector<8x128xi1>
    %110 = arith.select %109, %101, %79 : vector<8x128xi1>, vector<8x128xf32>
    %111 = vector.extract_strided_slice %11 {offsets = [0, 3, 0], sizes = [8, 1, 128], strides = [1, 1, 1]} : vector<8x8x128xf32> to vector<8x1x128xf32>
    %112 = vector.shape_cast %111 : vector<8x1x128xf32> to vector<8x128xf32>
    %c1_i32_34 = arith.constant 1 : i32
    %113 = tpu.dynamic_rotate %110 by %c1_i32_34 dim 1 : vector<8x128xf32>, i32 -> vector<8x128xf32>
    %cst_35 = arith.constant -1.000000e+30 : f32
    %114 = vector.broadcast %cst_35 : f32 to vector<8x128xf32>
    %115 = arith.select %2, %113, %114 : vector<8x128xi1>, vector<8x128xf32>
    %c2_i32_36 = arith.constant 2 : i32
    %116 = tpu.dynamic_rotate %110 by %c2_i32_36 dim 1 : vector<8x128xf32>, i32 -> vector<8x128xf32>
    %cst_37 = arith.constant -1.000000e+30 : f32
    %117 = vector.broadcast %cst_37 : f32 to vector<8x128xf32>
    %118 = arith.select %8, %116, %117 : vector<8x128xi1>, vector<8x128xf32>
    %119 = arith.maximumf %110, %115 : vector<8x128xf32>
    %120 = arith.minimumf %110, %115 : vector<8x128xf32>
    %121 = arith.maximumf %119, %118 : vector<8x128xf32>
    %122 = arith.minimumf %119, %118 : vector<8x128xf32>
    %123 = arith.subf %122, %121 : vector<8x128xf32>
    %124 = math.exp %123 : vector<8x128xf32>
    %cst_38 = arith.constant 1.000000e+00 : f32
    %125 = vector.broadcast %cst_38 : f32 to vector<8x128xf32>
    %126 = arith.addf %125, %124 : vector<8x128xf32>
    %127 = arith.subf %120, %121 : vector<8x128xf32>
    %128 = math.exp %127 : vector<8x128xf32>
    %129 = arith.addf %126, %128 : vector<8x128xf32>
    %130 = math.log %129 : vector<8x128xf32>
    %131 = arith.addf %121, %130 : vector<8x128xf32>
    %132 = arith.addf %131, %112 : vector<8x128xf32>
    %c3_i32 = arith.constant 3 : i32
    %133 = arith.addi %17, %c3_i32 : i32
    %c1_i32_39 = arith.constant 1 : i32
    %134 = arith.cmpi sge, %133, %c1_i32_39 : i32
    %135 = vector.broadcast %133 : i32 to vector<8x1xi32>
    %136 = arith.cmpi slt, %135, %15 : vector<8x1xi32>
    %137 = vector.broadcast %134 : i1 to vector<8x1xi1>
    %138 = arith.andi %137, %136 : vector<8x1xi1>
    %139 = vector.shape_cast %138 : vector<8x1xi1> to vector<8x1xi1>
    %140 = vector.broadcast %139 : vector<8x1xi1> to vector<8x128xi1>
    %141 = arith.select %140, %132, %110 : vector<8x128xi1>, vector<8x128xf32>
    %142 = vector.extract_strided_slice %11 {offsets = [0, 4, 0], sizes = [8, 1, 128], strides = [1, 1, 1]} : vector<8x8x128xf32> to vector<8x1x128xf32>
    %143 = vector.shape_cast %142 : vector<8x1x128xf32> to vector<8x128xf32>
    %c1_i32_40 = arith.constant 1 : i32
    %144 = tpu.dynamic_rotate %141 by %c1_i32_40 dim 1 : vector<8x128xf32>, i32 -> vector<8x128xf32>
    %cst_41 = arith.constant -1.000000e+30 : f32
    %145 = vector.broadcast %cst_41 : f32 to vector<8x128xf32>
    %146 = arith.select %2, %144, %145 : vector<8x128xi1>, vector<8x128xf32>
    %c2_i32_42 = arith.constant 2 : i32
    %147 = tpu.dynamic_rotate %141 by %c2_i32_42 dim 1 : vector<8x128xf32>, i32 -> vector<8x128xf32>
    %cst_43 = arith.constant -1.000000e+30 : f32
    %148 = vector.broadcast %cst_43 : f32 to vector<8x128xf32>
    %149 = arith.select %8, %147, %148 : vector<8x128xi1>, vector<8x128xf32>
    %150 = arith.maximumf %141, %146 : vector<8x128xf32>
    %151 = arith.minimumf %141, %146 : vector<8x128xf32>
    %152 = arith.maximumf %150, %149 : vector<8x128xf32>
    %153 = arith.minimumf %150, %149 : vector<8x128xf32>
    %154 = arith.subf %153, %152 : vector<8x128xf32>
    %155 = math.exp %154 : vector<8x128xf32>
    %cst_44 = arith.constant 1.000000e+00 : f32
    %156 = vector.broadcast %cst_44 : f32 to vector<8x128xf32>
    %157 = arith.addf %156, %155 : vector<8x128xf32>
    %158 = arith.subf %151, %152 : vector<8x128xf32>
    %159 = math.exp %158 : vector<8x128xf32>
    %160 = arith.addf %157, %159 : vector<8x128xf32>
    %161 = math.log %160 : vector<8x128xf32>
    %162 = arith.addf %152, %161 : vector<8x128xf32>
    %163 = arith.addf %162, %143 : vector<8x128xf32>
    %c4_i32 = arith.constant 4 : i32
    %164 = arith.addi %17, %c4_i32 : i32
    %c1_i32_45 = arith.constant 1 : i32
    %165 = arith.cmpi sge, %164, %c1_i32_45 : i32
    %166 = vector.broadcast %164 : i32 to vector<8x1xi32>
    %167 = arith.cmpi slt, %166, %15 : vector<8x1xi32>
    %168 = vector.broadcast %165 : i1 to vector<8x1xi1>
    %169 = arith.andi %168, %167 : vector<8x1xi1>
    %170 = vector.shape_cast %169 : vector<8x1xi1> to vector<8x1xi1>
    %171 = vector.broadcast %170 : vector<8x1xi1> to vector<8x128xi1>
    %172 = arith.select %171, %163, %141 : vector<8x128xi1>, vector<8x128xf32>
    %173 = vector.extract_strided_slice %11 {offsets = [0, 5, 0], sizes = [8, 1, 128], strides = [1, 1, 1]} : vector<8x8x128xf32> to vector<8x1x128xf32>
    %174 = vector.shape_cast %173 : vector<8x1x128xf32> to vector<8x128xf32>
    %c1_i32_46 = arith.constant 1 : i32
    %175 = tpu.dynamic_rotate %172 by %c1_i32_46 dim 1 : vector<8x128xf32>, i32 -> vector<8x128xf32>
    %cst_47 = arith.constant -1.000000e+30 : f32
    %176 = vector.broadcast %cst_47 : f32 to vector<8x128xf32>
    %177 = arith.select %2, %175, %176 : vector<8x128xi1>, vector<8x128xf32>
    %c2_i32_48 = arith.constant 2 : i32
    %178 = tpu.dynamic_rotate %172 by %c2_i32_48 dim 1 : vector<8x128xf32>, i32 -> vector<8x128xf32>
    %cst_49 = arith.constant -1.000000e+30 : f32
    %179 = vector.broadcast %cst_49 : f32 to vector<8x128xf32>
    %180 = arith.select %8, %178, %179 : vector<8x128xi1>, vector<8x128xf32>
    %181 = arith.maximumf %172, %177 : vector<8x128xf32>
    %182 = arith.minimumf %172, %177 : vector<8x128xf32>
    %183 = arith.maximumf %181, %180 : vector<8x128xf32>
    %184 = arith.minimumf %181, %180 : vector<8x128xf32>
    %185 = arith.subf %184, %183 : vector<8x128xf32>
    %186 = math.exp %185 : vector<8x128xf32>
    %cst_50 = arith.constant 1.000000e+00 : f32
    %187 = vector.broadcast %cst_50 : f32 to vector<8x128xf32>
    %188 = arith.addf %187, %186 : vector<8x128xf32>
    %189 = arith.subf %182, %183 : vector<8x128xf32>
    %190 = math.exp %189 : vector<8x128xf32>
    %191 = arith.addf %188, %190 : vector<8x128xf32>
    %192 = math.log %191 : vector<8x128xf32>
    %193 = arith.addf %183, %192 : vector<8x128xf32>
    %194 = arith.addf %193, %174 : vector<8x128xf32>
    %c5_i32 = arith.constant 5 : i32
    %195 = arith.addi %17, %c5_i32 : i32
    %c1_i32_51 = arith.constant 1 : i32
    %196 = arith.cmpi sge, %195, %c1_i32_51 : i32
    %197 = vector.broadcast %195 : i32 to vector<8x1xi32>
    %198 = arith.cmpi slt, %197, %15 : vector<8x1xi32>
    %199 = vector.broadcast %196 : i1 to vector<8x1xi1>
    %200 = arith.andi %199, %198 : vector<8x1xi1>
    %201 = vector.shape_cast %200 : vector<8x1xi1> to vector<8x1xi1>
    %202 = vector.broadcast %201 : vector<8x1xi1> to vector<8x128xi1>
    %203 = arith.select %202, %194, %172 : vector<8x128xi1>, vector<8x128xf32>
    %204 = vector.extract_strided_slice %11 {offsets = [0, 6, 0], sizes = [8, 1, 128], strides = [1, 1, 1]} : vector<8x8x128xf32> to vector<8x1x128xf32>
    %205 = vector.shape_cast %204 : vector<8x1x128xf32> to vector<8x128xf32>
    %c1_i32_52 = arith.constant 1 : i32
    %206 = tpu.dynamic_rotate %203 by %c1_i32_52 dim 1 : vector<8x128xf32>, i32 -> vector<8x128xf32>
    %cst_53 = arith.constant -1.000000e+30 : f32
    %207 = vector.broadcast %cst_53 : f32 to vector<8x128xf32>
    %208 = arith.select %2, %206, %207 : vector<8x128xi1>, vector<8x128xf32>
    %c2_i32_54 = arith.constant 2 : i32
    %209 = tpu.dynamic_rotate %203 by %c2_i32_54 dim 1 : vector<8x128xf32>, i32 -> vector<8x128xf32>
    %cst_55 = arith.constant -1.000000e+30 : f32
    %210 = vector.broadcast %cst_55 : f32 to vector<8x128xf32>
    %211 = arith.select %8, %209, %210 : vector<8x128xi1>, vector<8x128xf32>
    %212 = arith.maximumf %203, %208 : vector<8x128xf32>
    %213 = arith.minimumf %203, %208 : vector<8x128xf32>
    %214 = arith.maximumf %212, %211 : vector<8x128xf32>
    %215 = arith.minimumf %212, %211 : vector<8x128xf32>
    %216 = arith.subf %215, %214 : vector<8x128xf32>
    %217 = math.exp %216 : vector<8x128xf32>
    %cst_56 = arith.constant 1.000000e+00 : f32
    %218 = vector.broadcast %cst_56 : f32 to vector<8x128xf32>
    %219 = arith.addf %218, %217 : vector<8x128xf32>
    %220 = arith.subf %213, %214 : vector<8x128xf32>
    %221 = math.exp %220 : vector<8x128xf32>
    %222 = arith.addf %219, %221 : vector<8x128xf32>
    %223 = math.log %222 : vector<8x128xf32>
    %224 = arith.addf %214, %223 : vector<8x128xf32>
    %225 = arith.addf %224, %205 : vector<8x128xf32>
    %c6_i32 = arith.constant 6 : i32
    %226 = arith.addi %17, %c6_i32 : i32
    %c1_i32_57 = arith.constant 1 : i32
    %227 = arith.cmpi sge, %226, %c1_i32_57 : i32
    %228 = vector.broadcast %226 : i32 to vector<8x1xi32>
    %229 = arith.cmpi slt, %228, %15 : vector<8x1xi32>
    %230 = vector.broadcast %227 : i1 to vector<8x1xi1>
    %231 = arith.andi %230, %229 : vector<8x1xi1>
    %232 = vector.shape_cast %231 : vector<8x1xi1> to vector<8x1xi1>
    %233 = vector.broadcast %232 : vector<8x1xi1> to vector<8x128xi1>
    %234 = arith.select %233, %225, %203 : vector<8x128xi1>, vector<8x128xf32>
    %235 = vector.extract_strided_slice %11 {offsets = [0, 7, 0], sizes = [8, 1, 128], strides = [1, 1, 1]} : vector<8x8x128xf32> to vector<8x1x128xf32>
    %236 = vector.shape_cast %235 : vector<8x1x128xf32> to vector<8x128xf32>
    %c1_i32_58 = arith.constant 1 : i32
    %237 = tpu.dynamic_rotate %234 by %c1_i32_58 dim 1 : vector<8x128xf32>, i32 -> vector<8x128xf32>
    %cst_59 = arith.constant -1.000000e+30 : f32
    %238 = vector.broadcast %cst_59 : f32 to vector<8x128xf32>
    %239 = arith.select %2, %237, %238 : vector<8x128xi1>, vector<8x128xf32>
    %c2_i32_60 = arith.constant 2 : i32
    %240 = tpu.dynamic_rotate %234 by %c2_i32_60 dim 1 : vector<8x128xf32>, i32 -> vector<8x128xf32>
    %cst_61 = arith.constant -1.000000e+30 : f32
    %241 = vector.broadcast %cst_61 : f32 to vector<8x128xf32>
    %242 = arith.select %8, %240, %241 : vector<8x128xi1>, vector<8x128xf32>
    %243 = arith.maximumf %234, %239 : vector<8x128xf32>
    %244 = arith.minimumf %234, %239 : vector<8x128xf32>
    %245 = arith.maximumf %243, %242 : vector<8x128xf32>
    %246 = arith.minimumf %243, %242 : vector<8x128xf32>
    %247 = arith.subf %246, %245 : vector<8x128xf32>
    %248 = math.exp %247 : vector<8x128xf32>
    %cst_62 = arith.constant 1.000000e+00 : f32
    %249 = vector.broadcast %cst_62 : f32 to vector<8x128xf32>
    %250 = arith.addf %249, %248 : vector<8x128xf32>
    %251 = arith.subf %244, %245 : vector<8x128xf32>
    %252 = math.exp %251 : vector<8x128xf32>
    %253 = arith.addf %250, %252 : vector<8x128xf32>
    %254 = math.log %253 : vector<8x128xf32>
    %255 = arith.addf %245, %254 : vector<8x128xf32>
    %256 = arith.addf %255, %236 : vector<8x128xf32>
    %c7_i32 = arith.constant 7 : i32
    %257 = arith.addi %17, %c7_i32 : i32
    %c1_i32_63 = arith.constant 1 : i32
    %258 = arith.cmpi sge, %257, %c1_i32_63 : i32
    %259 = vector.broadcast %257 : i32 to vector<8x1xi32>
    %260 = arith.cmpi slt, %259, %15 : vector<8x1xi32>
    %261 = vector.broadcast %258 : i1 to vector<8x1xi1>
    %262 = arith.andi %261, %260 : vector<8x1xi1>
    %263 = vector.shape_cast %262 : vector<8x1xi1> to vector<8x1xi1>
    %264 = vector.broadcast %263 : vector<8x1xi1> to vector<8x128xi1>
    %265 = arith.select %264, %256, %234 : vector<8x128xi1>, vector<8x128xf32>
    %c0_64 = arith.constant 0 : index
    %c0_65 = arith.constant 0 : index
    %266 = vector.load %arg9[%c0_64, %c0_65] : memref<8x128xf32, #tpu.memory_space<vmem>>, vector<8x128xf32>
    tpu.vector_store %arg9[%c0_64, %c0_65], %265 {strides = array<i32>} : memref<8x128xf32, #tpu.memory_space<vmem>>, vector<8x128xf32>,
    %c1_i32_66 = arith.constant 1 : i32
    %267 = arith.cmpi eq, %arg1, %c1_i32_66 : i32
    %268 = arith.extui %267 : i1 to i32
    %c0_i32_67 = arith.constant 0 : i32
    %269 = arith.cmpi ne, %268, %c0_i32_67 : i32
    scf.if %269 {
      %c0_68 = arith.constant 0 : index
      %c0_69 = arith.constant 0 : index
      %270 = vector.load %arg6[%c0_68, %c0_69] : memref<8x1xi32, #tpu.memory_space<vmem>>, vector<8x1xi32>
      %c2_i32_70 = arith.constant 2 : i32
      %271 = vector.broadcast %c2_i32_70 : i32 to vector<8x1xi32>
      %272 = arith.muli %271, %270 : vector<8x1xi32>
      %c1_i32_71 = arith.constant 1 : i32
      %273 = vector.broadcast %c1_i32_71 : i32 to vector<8x1xi32>
      %274 = arith.addi %272, %273 : vector<8x1xi32>
      %c1_i32_72 = arith.constant 1 : i32
      %275 = vector.broadcast %c1_i32_72 : i32 to vector<8x1xi32>
      %276 = arith.subi %274, %275 : vector<8x1xi32>
      %277 = vector.broadcast %276 : vector<8x1xi32> to vector<8x128xi32>
      %278 = arith.cmpi eq, %0, %277 : vector<8x128xi32>
      %c2_i32_73 = arith.constant 2 : i32
      %279 = vector.broadcast %c2_i32_73 : i32 to vector<8x1xi32>
      %280 = arith.subi %274, %279 : vector<8x1xi32>
      %281 = vector.broadcast %280 : vector<8x1xi32> to vector<8x128xi32>
      %282 = arith.cmpi eq, %0, %281 : vector<8x128xi32>
      %c1_i32_74 = arith.constant 1 : i32
      %283 = vector.broadcast %c1_i32_74 : i32 to vector<8x1xi32>
      %284 = arith.cmpi sge, %270, %283 : vector<8x1xi32>
      %285 = vector.broadcast %284 : vector<8x1xi1> to vector<8x128xi1>
      %286 = arith.andi %282, %285 : vector<8x128xi1>
      %287 = arith.ori %278, %286 : vector<8x128xi1>
      %cst_75 = arith.constant -1.000000e+30 : f32
      %288 = vector.broadcast %cst_75 : f32 to vector<8x128xf32>
      %289 = arith.select %287, %265, %288 : vector<8x128xi1>, vector<8x128xf32>
      %cst_76 = arith.constant dense<0xFF800000> : vector<8xf32>
      %290 = vector.multi_reduction <maximumf>, %289, %cst_76 [1] : vector<8x128xf32> to vector<8xf32>
      %291 = vector.shape_cast %290 : vector<8xf32> to vector<8x1xf32>
      %292 = vector.broadcast %291 : vector<8x1xf32> to vector<8x128xf32>
      %293 = arith.subf %289, %292 : vector<8x128xf32>
      %294 = math.exp %293 : vector<8x128xf32>
      %cst_77 = arith.constant dense<0.000000e+00> : vector<8xf32>
      %295 = vector.multi_reduction <add>, %294, %cst_77 [1] : vector<8x128xf32> to vector<8xf32>
      %296 = vector.shape_cast %295 : vector<8xf32> to vector<8x1xf32>
      %297 = math.log %296 : vector<8x1xf32>
      %298 = arith.addf %291, %297 : vector<8x1xf32>
      %cst_78 = arith.constant 0.000000e+00 : f32
      %299 = vector.broadcast %cst_78 : f32 to vector<8x1xf32>
      %300 = arith.subf %299, %298 : vector<8x1xf32>
      %cst_79 = arith.constant 1.000000e+29 : f32
      %301 = vector.broadcast %cst_79 : f32 to vector<8x1xf32>
      %302 = arith.cmpf ogt, %300, %301 : vector<8x1xf32>
      %cst_80 = arith.constant 0.000000e+00 : f32
      %303 = vector.broadcast %cst_80 : f32 to vector<8x1xf32>
      %304 = arith.select %302, %303, %300 : vector<8x1xi1>, vector<8x1xf32>
      %c1_i32_81 = arith.constant 1 : i32
      %305 = vector.broadcast %c1_i32_81 : i32 to vector<8x1xi32>
      %306 = arith.maxsi %270, %305 : vector<8x1xi32>
      %307 = arith.sitofp %306 : vector<8x1xi32> to vector<8x1xf32>
      %308 = arith.divf %304, %307 : vector<8x1xf32>
      %c0_82 = arith.constant 0 : index
      %c0_83 = arith.constant 0 : index
      %309 = vector.load %arg7[%c0_82, %c0_83] : memref<8x1xf32, #tpu.memory_space<vmem>>, vector<8x1xf32>
      %310 = arith.mulf %308, %309 : vector<8x1xf32>
      %c0_84 = arith.constant 0 : index
      %c0_85 = arith.constant 0 : index
      %311 = vector.load %arg8[%c0_84, %c0_85] : memref<8x1xf32, #tpu.memory_space<vmem>>, vector<8x1xf32>
      tpu.vector_store %arg8[%c0_84, %c0_85], %310 {strides = array<i32>} : memref<8x1xf32, #tpu.memory_space<vmem>>, vector<8x1xf32>,
    } else {
    }
    return
  }
  func.func @transform_0(%arg0: i32, %arg1: i32) -> (i32, i32, i32) {
    %c0_i32 = arith.constant 0 : i32
    %c0_i32_0 = arith.constant 0 : i32
    return %arg0, %arg1, %c0_i32 : i32, i32, i32
  }
  func.func @transform_1(%arg0: i32, %arg1: i32) -> (i32, i32, i32) {
    %c0_i32 = arith.constant 0 : i32
    %c0_i32_0 = arith.constant 0 : i32
    %c0_i32_1 = arith.constant 0 : i32
    return %arg0, %c0_i32, %c0_i32_0 : i32, i32, i32
  }
  func.func @transform_2(%arg0: i32, %arg1: i32) -> (i32, i32) {
    %c0_i32 = arith.constant 0 : i32
    %c0_i32_0 = arith.constant 0 : i32
    return %arg0, %c0_i32 : i32, i32
  }
  func.func @transform_3(%arg0: i32, %arg1: i32) -> (i32, i32) {
    %c0_i32 = arith.constant 0 : i32
    %c0_i32_0 = arith.constant 0 : i32
    return %arg0, %c0_i32 : i32, i32
  }
  func.func @transform_4(%arg0: i32, %arg1: i32) -> (i32, i32) {
    %c0_i32 = arith.constant 0 : i32
    %c0_i32_0 = arith.constant 0 : i32
    return %arg0, %c0_i32 : i32, i32
  }
  func.func @transform_5(%arg0: i32, %arg1: i32) -> (i32, i32) {
    %c0_i32 = arith.constant 0 : i32
    %c0_i32_0 = arith.constant 0 : i32
    return %arg0, %c0_i32 : i32, i32
  }
  func.func @transform_6(%arg0: i32, %arg1: i32) -> (i32, i32) {
    %c0_i32 = arith.constant 0 : i32
    %c0_i32_0 = arith.constant 0 : i32
    return %arg0, %c0_i32 : i32, i32
  }
}

</mosaic_0001>

<bundles_post_ra>
// kernel: tpu_custom_call.1
= control target key start
LH: loop header
LB: loop body
LE: loop exit
PB: predicated region body
PF: predicated region fallthrough
CT: control target
= control target key end

     0   :  { %11 = vsyncpa [#allocation4], 0  ;;  %s3491_s0 = inlined_call_operand.hbm [shape: f32[8,16,128], index: 0, kind: input, shape index: {}]   ;;  %s3492_s1 = inlined_call_operand.hbm [shape: f32[8,128,128], index: 1, kind: input, shape index: {}]   ;;  %s3493_s2 = inlined_call_operand.hbm [shape: f32[8,128], index: 2, kind: input, shape index: {}]   ;;  %s3494_s3 = inlined_call_operand.hbm [shape: s32[8,1], index: 3, kind: input, shape index: {}]   ;;  %s3495_s4 = inlined_call_operand.hbm [shape: s32[8,1], index: 4, kind: input, shape index: {}]   ;;  %s3496_s5 = inlined_call_operand.hbm [shape: f32[8,1], index: 5, kind: input, shape index: {}]   ;;  %s3497_s6 = inlined_call_operand.hbm [shape: f32[8,1], index: 6, kind: output, shape index: {}]  }
   0x1   :  { %13 = vsyncpa [#allocation4 + $0x1], 0 }
   0x2   :  { %14 = vsyncpa [#allocation7], 0 }
   0x3   :  { %15 = vsyncpa [#allocation10], 0 }
   0x4   :  { %16 = vsyncpa [#allocation13], 0 }
   0x5   :  { %17 = vsyncpa [#allocation5], 0  ;;  %s2856_s21 = smov 0   ;;  %s2858_s22 = smov 0  }
   0x6   :  { %s2860_s23 = smov 0   ;;  %s2862_s24 = smov 0  }
   0x7   :  { %s2864_s25 = smov 0   ;;  %s2866_s26 = smov 0  }
   0x8 LB: > { %s3500_s27 = sadd.s32 4294967295, %s2802_s26   ;;  %p57_p0 = scmp.ne.s32.totalorder %s2786_s22, %s2782_s21  ;;  %s2802_s26 = sphi %s2866_s26, %s23_s26   ;;  %s2798_s25 = sphi %s2864_s25, %s3523_s25   ;;  %s2794_s24 = sphi %s2862_s24, %s3522_s24   ;;  %s2790_s23 = sphi %s2860_s23, %s3521_s23   ;;  %s2786_s22 = sphi %s2858_s22, %s3520_s22   ;;  %s2782_s21 = sphi %s2856_s21, %s3519_s21  }
   0x9   : > { %p2888_p1 = scmp.eq.s32.totalorder %s3500_s27, 0  ;;  %p1727_p2 = scmp.ge.s32.totalorder %s2802_s26, 1 }
   0xa   : > { %p224_p3 = scmp.lt.s32.totalorder %s2802_s26, 3  ;;  %s2804_s7 = smov [#allocation6]  }
   0xb   : > { %s3504_s28 = scalar_select %p2888_p1, 1, 0 }
   0xc   : > { %p2896_p4 = por %p2888_p1, %p57_p0  ;;  %p2900_p5 = pnand %p1727_p2, %p224_p3 }
   0xd   : > { %s240_s8 = sshll.u32 %s2804_s7, 4  ;;  %s2805_s10 = smov [#allocation9]   ;;  %s2904_s8 = int_to_ptr.vmem [resolvable:$true] %s240_s8 }
   0xe   : > { %s3505_s29 = scalar_select %p2896_p4, 1, 0 }
   0xf   : > { %s3506_s30 = scalar_select %p2900_p5, 1, 0 }
  0x10   : > { %p2385_p6 = pneg %p2900_p5  ;;  %s269_s11 = sshll.u32 %s2805_s10, 4  ;;  %s2914_s11 = int_to_ptr.vmem [resolvable:$true] %s269_s11 }
  0x11   : > { %s2806_s12 = smov [#allocation8]   ;;  %s2540_s16 = scalar_lea.hbm %s3492_s1, 16384 }
  0x12   : > { %p2910_p7 = pnand %p2385_p6, %p2888_p1  ;;  %s2916_s13 = sshll.u32 %s2806_s12, 4  ;;  %s257_s13 = int_to_ptr.vmem [resolvable:$true] %s2916_s13 }
  0x13   : > { %p2541_p8 = scmp.ne.s32.totalorder %s3492_s1, %s2540_s16  ;;  %p2547_p12 = scmp.lt.u32.totalorder %s2540_s16, %s3492_s1 }
  0x14   : > { %p2926_p9 = pneg %p2910_p7 }
  0x16   : > { %p2543_p10 = pnand %p2926_p9, %p2541_p8 }
  0x18   : > { %p2544_p11 = pneg %p2543_p10 }
  0x1a   : > { %p2549_p13 = pnand %p2547_p12, %p2544_p11 }
  0x1c   : > { %2552 = shalt.err (!%p2549_p13)
}
  0x1d   : > { %s2553_s7 = scalar_lea.vmem %s2904_s8, 16384  ;;  %p2561_p6 = scmp.lt.s32.totalorder %s2904_s8, %s2904_s8 }
  0x1e   : > { %p2554_p0 = scmp.ne.s32.totalorder %s2904_s8, %s2553_s7  ;;  %p2562_p1 = scmp.lt.s32.totalorder %s2553_s7, %s2553_s7 }
  0x20   : > { %p2556_p2 = pnand %p2554_p0, %p2926_p9  ;;  %p2563_p8 = por %p2562_p1, %p2561_p6 }
  0x22   : > { %p2557_p3 = pneg %p2556_p2 }
  0x24   : > { %p2564_p10 = pnand %p2563_p8, %p2557_p3 }
  0x26   : > { %2567 = shalt.err (!%p2564_p10)
}
  0x27   : > { %s3503_s10 = smov 128   ;;  %s2808_s12 = smov 8  }
  0x28   : > { %2388 = dma.hbm_to_vmem [thread:$0]  (!%p2910_p7), %s3492_s1, 16384, %s2904_s8, [#allocation7], %s3503_s10, %s3503_s10, %s2808_s12  }
  0x29   : > { %s2568_s18 = scalar_lea.hbm %s3494_s3, 128 }
  0x2a   : > { %p2569_p1 = scmp.ne.s32.totalorder %s3494_s3, %s2568_s18  ;;  %p2575_p13 = scmp.lt.u32.totalorder %s2568_s18, %s3494_s3 }
  0x2c   : > { %p2571_p11 = pnand %p2569_p1, %p2926_p9 }
  0x2e   : > { %p2572_p12 = pneg %p2571_p11 }
  0x30   : > { %p2577_p0 = pnand %p2575_p13, %p2572_p12 }
  0x32   : > { %2580 = shalt.err (!%p2577_p0)
}
  0x33   : > { %s2581_s8 = scalar_lea.vmem %s2914_s11, 128  ;;  %p2589_p8 = scmp.lt.s32.totalorder %s2914_s11, %s2914_s11 }
  0x34   : > { %p2582_p2 = scmp.ne.s32.totalorder %s2914_s11, %s2581_s8  ;;  %p2590_p10 = scmp.lt.s32.totalorder %s2581_s8, %s2581_s8 }
  0x36   : > { %p2584_p3 = pnand %p2582_p2, %p2926_p9  ;;  %p2591_p1 = por %p2590_p10, %p2589_p8 }
  0x38   : > { %p2585_p6 = pneg %p2584_p3 }
  0x3a   : > { %p2592_p11 = pnand %p2591_p1, %p2585_p6 }
  0x3c   : > { %2595 = shalt.err (!%p2592_p11)
}
  0x3d   : > { %2394 = dma.hbm_to_vmem [thread:$0]  (!%p2910_p7), %s3494_s3, 128, %s2914_s11, [#allocation10]  }
  0x3e   : > { %s2596_s17 = scalar_lea.hbm %s3493_s2, 128 }
  0x3f   : > { %p2597_p12 = scmp.ne.s32.totalorder %s3493_s2, %s2596_s17  ;;  %p2603_p2 = scmp.lt.u32.totalorder %s2596_s17, %s3493_s2 }
  0x41   : > { %p2599_p13 = pnand %p2597_p12, %p2926_p9 }
  0x43   : > { %p2600_p0 = pneg %p2599_p13 }
  0x45   : > { %p2605_p3 = pnand %p2603_p2, %p2600_p0 }
  0x47   : > { %2608 = shalt.err (!%p2605_p3)
}
  0x48   : > { %s2609_s8 = scalar_lea.vmem %s257_s13, 128  ;;  %p2617_p1 = scmp.lt.s32.totalorder %s257_s13, %s257_s13 }
  0x49   : > { %p2610_p6 = scmp.ne.s32.totalorder %s257_s13, %s2609_s8  ;;  %p2618_p11 = scmp.lt.s32.totalorder %s2609_s8, %s2609_s8 }
  0x4b   : > { %p2612_p8 = pnand %p2610_p6, %p2926_p9  ;;  %p2619_p4 = por %p2618_p11, %p2617_p1 }
  0x4d   : > { %p2613_p10 = pneg %p2612_p8 }
  0x4f   : > { %p2620_p5 = pnand %p2619_p4, %p2613_p10 }
  0x51   : > { %2623 = shalt.err (!%p2620_p5)
}
  0x52   : > { %2391 = dma.hbm_to_vmem [thread:$0]  (!%p2910_p7), %s3493_s2, 128, %s257_s13, [#allocation7]  }
  0x53   : > { %s2809_s14 = smov [#allocation11]   ;;  %s2810_s16 = smov [#allocation12]  }
  0x54   : > { %s282_s15 = sshll.u32 %s2809_s14, 4  ;;  %s295_s17 = sshll.u32 %s2810_s16, 4  ;;  %s283_s15 = int_to_ptr.vmem [resolvable:$true] %s282_s15  ;;  %s296_s17 = int_to_ptr.vmem [resolvable:$true] %s295_s17 }
  0x55   : > { %s2624_s21 = scalar_lea.hbm %s3495_s4, 128 }
  0x56   : > { %p2625_p4 = scmp.ne.s32.totalorder %s3495_s4, %s2624_s21  ;;  %p2631_p13 = scmp.lt.u32.totalorder %s2624_s21, %s3495_s4 }
  0x58   : > { %p2627_p5 = pnand %p2625_p4, %p2926_p9 }
  0x5a   : > { %p2628_p12 = pneg %p2627_p5 }
  0x5c   : > { %p2633_p0 = pnand %p2631_p13, %p2628_p12 }
  0x5e   : > { %2636 = shalt.err (!%p2633_p0)
}
  0x5f   : > { %s2637_s13 = scalar_lea.vmem %s283_s15, 128  ;;  %p2645_p8 = scmp.lt.s32.totalorder %s283_s15, %s283_s15 }
  0x60   : > { %p2638_p2 = scmp.ne.s32.totalorder %s283_s15, %s2637_s13  ;;  %p2646_p10 = scmp.lt.s32.totalorder %s2637_s13, %s2637_s13 }
  0x62   : > { %p2640_p3 = pnand %p2638_p2, %p2926_p9  ;;  %p2647_p1 = por %p2646_p10, %p2645_p8 }
  0x64   : > { %p2641_p6 = pneg %p2640_p3 }
  0x66   : > { %p2648_p11 = pnand %p2647_p1, %p2641_p6 }
  0x68   : > { %2651 = shalt.err (!%p2648_p11)
}
  0x69   : > { %2397 = dma.hbm_to_vmem [thread:$0]  (!%p2910_p7), %s3495_s4, 128, %s283_s15, [#allocation10]  }
  0x6a   : > { %s2652_s18 = scalar_lea.hbm %s3496_s5, 128 }
  0x6b   : > { %p2653_p4 = scmp.ne.s32.totalorder %s3496_s5, %s2652_s18  ;;  %p2659_p13 = scmp.lt.u32.totalorder %s2652_s18, %s3496_s5 }
  0x6d   : > { %p2655_p5 = pnand %p2653_p4, %p2926_p9 }
  0x6f   : > { %p2656_p12 = pneg %p2655_p5 }
  0x71   : > { %p2661_p0 = pnand %p2659_p13, %p2656_p12 }
  0x73   : > { %2664 = shalt.err (!%p2661_p0)
}
  0x74   : > { %s2665_s11 = scalar_lea.vmem %s296_s17, 128  ;;  %p2673_p8 = scmp.lt.s32.totalorder %s296_s17, %s296_s17 }
  0x75   : > { %p2666_p2 = scmp.ne.s32.totalorder %s296_s17, %s2665_s11  ;;  %p2674_p10 = scmp.lt.s32.totalorder %s2665_s11, %s2665_s11 }
  0x77   : > { %p2668_p3 = pnand %p2666_p2, %p2926_p9  ;;  %p2675_p1 = por %p2674_p10, %p2673_p8 }
  0x79   : > { %p2669_p6 = pneg %p2668_p3 }
  0x7b   : > { %p2676_p11 = pnand %p2675_p1, %p2669_p6 }
  0x7d   : > { %2679 = shalt.err (!%p2676_p11)
}
  0x7e   : > { %2400 = dma.hbm_to_vmem [thread:$0]  (!%p2910_p7), %s3496_s5, 128, %s296_s17, [#allocation13]  }
  0x7f   : > { %s44_s19 = sadd.s32 1, %s2790_s23  ;;  %s32_s27 = sadd.s32 1, %s2798_s25 }
  0x80   : > { %p51_p9 = scmp.ne.s32.totalorder %s2790_s23, %s2786_s22  ;;  %p33_p4 = scmp.ge.s32.totalorder %s32_s27, 2 }
  0x81   : > { %p52_p5 = scmp.eq.s32.totalorder %s2802_s26, 0  ;;  %p2410_p12 = scmp.lt.s32.totalorder %s2802_s26, 2 }
  0x82   : > { %s306_s9 = sand.u32 1, %s2790_s23   ;;  %s3525_s27 = smov (%p33_p4, %s32_s27), 0 }
  0x83   : > { %p53_p13 = por %p52_p5, %p51_p9  ;;  %s40_s14 = ssub.s32 %s2798_s25, %s3525_s27 }
  0x84   : > { %s1734_s10 = sshll.u32 %s306_s9, 6  ;;  %p42_p0 = scmp.eq.s32.totalorder %s40_s14, 0 }
  0x85   : > { %s1735_s16 = sshll.u32 %s2798_s25, 7  ;;  %s310_s18 = scalar_lea.vmem [#allocation3], %s1734_s10 }
  0x86   : > { %s319_s20 = sshll.u32 %s310_s18, 4  ;;  %s3046_s8 = scalar_lea.hbm %s3491_s0, %s1735_s16  ;;  %s3048_s20 = int_to_ptr.vmem [resolvable:$true] %s319_s20 }
  0x87   : > { %s3041_s17 = scalar_select %p42_p0, %s2790_s23, %s44_s19  }
  0x88   : > { %p3052_p7 = pnand %p2410_p12, %p53_p13  ;;  %s3056_s15 = scalar_lea.sflag [#allocation4], %s306_s9 }
  0x89   : > { %s2680_s13 = scalar_lea.hbm %s3046_s8, 1024  ;;  %s2685_s10 = scalar_lea.hbm %s3491_s0, 2048 }
  0x8a   : > { %p2681_p2 = scmp.ne.s32.totalorder %s3046_s8, %s2680_s13  ;;  %p2682_p3 = pneg %p3052_p7 }
  0x8b   : > { %p2686_p10 = scmp.lt.u32.totalorder %s3046_s8, %s3491_s0  ;;  %p2687_p1 = scmp.lt.u32.totalorder %s2685_s10, %s2680_s13 }
  0x8c   : > { %p2683_p6 = pnand %p2682_p3, %p2681_p2  ;;  %p2689_p9 = scmp.lt.u32.totalorder %s2680_s13, %s3046_s8 }
  0x8d   : > { %p2688_p11 = por %p2687_p1, %p2686_p10 }
  0x8e   : > { %p2684_p8 = pneg %p2683_p6 }
  0x8f   : > { %p2690_p4 = por %p2689_p9, %p2688_p11 }
  0x91   : > { %p2691_p5 = pnand %p2690_p4, %p2684_p8 }
  0x93   : > { %2694 = shalt.err (!%p2691_p5)
}
  0x94   : > { %s2695_s9 = scalar_lea.vmem %s3048_s20, 1024  ;;  %s2811_s21 = smov [#allocation3]  }
  0x95   : > { %p2696_p12 = scmp.ne.s32.totalorder %s3048_s20, %s2695_s9  ;;  %s2700_s7 = sshll.u32 %s2811_s21, 4  ;;  %s2701_s7 = int_to_ptr.vmem [resolvable:$false] %s2700_s7 }
  0x96   : > { %s2702_s19 = scalar_lea.vmem %s2701_s7, 2048  ;;  %p2703_p2 = scmp.lt.s32.totalorder %s3048_s20, %s2701_s7 }
  0x97   : > { %p2698_p13 = pnand %p2696_p12, %p2682_p3  ;;  %p2704_p6 = scmp.lt.s32.totalorder %s2702_s19, %s2695_s9 }
  0x99   : > { %p2699_p0 = pneg %p2698_p13  ;;  %p2705_p10 = por %p2704_p6, %p2703_p2 }
  0x9b   : > { %p2706_p1 = pnand %p2705_p10, %p2699_p0 }
  0x9d   : > { %2709 = shalt.err (!%p2706_p1)
}
  0x9e   : > { %s2812_s13 = smov 256   ;;  %s3510_s14 = smov 128  }
  0x9f   : > { %2404 = dma.hbm_to_vmem [thread:$0]  (!%p3052_p7), %s3046_s8, 1024, %s3048_s20, %s3056_s15, %s2812_s13, %s3510_s14, %s2808_s12  }
  0xa0   : > { %p3511_p3 = scmp.ne.s32.totalorder %s3506_s30, 0 }
  0xa1   : > { %s333_s10 = sand.u32 (!%p3511_p3), 1, %s2786_s22   ;;  %p3512_p8 = scmp.ne.s32.totalorder (!%p3511_p3), %s3505_s29, 0 }
  0xa2   : > { %331 = sbr.rel (%p3511_p3) target bundleno = 2361 (0x939), region = 44  ;;  %s1737_s16 = sshll.u32 (!%p3511_p3), %s333_s10, 6 }
  0xa3   : > { %s334_s18 = scalar_lea.sflag (!%p3511_p3), [#allocation4], %s333_s10  ;;  %s3089_s9 = scalar_lea.vmem (!%p3511_p3), [#allocation3], %s1737_s16 }
  0xa9   : > { %2761 = dma.done.wait (%p3512_p8), %s334_s18, 1024  }
  0xaa   : > { %2763 = vsyncadd (%p3512_p8), %s334_s18, 4294966272  ;;  %p3513_p11 = scmp.ne.s32.totalorder %s3504_s28, 0 }
  0xac   : > { %2765 = dma.done.wait (%p3513_p11), [#allocation7], 16512  }
  0xad   : > { %2767 = vsyncadd (%p3513_p11), [#allocation7], 4294950784 }
  0xae   : > { %2769 = dma.done.wait (%p3513_p11), [#allocation10], 256  }
  0xaf   : > { %2771 = vsyncadd (%p3513_p11), [#allocation10], 4294967040 }
  0xb0   : > { %2773 = dma.done.wait (%p3513_p11), [#allocation13], 128  }
  0xb1   : > { %2775 = vsyncadd (%p3513_p11), [#allocation13], 4294967168  ;;  %v383_v0 = vlaneseq  ;;  %v2813_v1 = vmov 0.0|0.0   ;;  %vm2814_vm0 = vmmov 0   ;;  %v2815_v3 = vmov 0.0   ;;  %v387_v4 = vld [vmem:[#allocation8] sm:$0xff] }
  0xb2   : > { %2167 = vmatprep.subr.bf16.mxu0 %v2813_v1  ;;  %2191 = vmatprep.subr.bf16.mxu1 %v2813_v1  ;;  %v398_v5 = vld [vmem:[#allocation6] sm:$0xff]  ;;  %v399_v6 = vld [vmem:[#allocation6 + $0x8] sm:$0xff]  ;;  %vm388_vm3 = vcmp.gt.f32.partialorder %v387_v4, 0.5  ;;  %v400_v12 = vld [vmem:[#allocation6 + $0x10] sm:$0xff]  ;;  %p1743_p7 = scmp.ne.s32.totalorder %s2794_s24, 0 }
  0xb3   : > { %v3109_v2 = vand.u32 127, %v383_v0  ;;  %1919 = vmatprep.mubr.msk.f32.mxu0 %vm2814_vm0, %v2815_v3  ;;  %1954 = vmatprep.mubr.msk.f32.mxu1 %vm2814_vm0, %v2815_v3  ;;  %v2168_v7 = vpack.c.bf16 %v399_v6, %v398_v5  ;;  %v414_v8 = vld [vmem:[#allocation6 + $0x80] sm:$0xff]  ;;  %v415_v9 = vld [vmem:[#allocation6 + $0x88] sm:$0xff]  ;;  %v401_v13 = vld [vmem:[#allocation6 + $0x18] sm:$0xff]  ;;  %vm1100_vm5 = vcmask (!%p1743_p7), 1041409   ;;  %vm1103_vm6 = vcmask (!%p1743_p7), 1042434  }
  0xb4   : > { %v2192_v11 = vpack.c.bf16 %v415_v9, %v414_v8  ;;  %v416_v14 = vld [vmem:[#allocation6 + $0x90] sm:$0xff]  ;;  %v417_v15 = vld [vmem:[#allocation6 + $0x98] sm:$0xff]  ;;  %v2171_v16 = vpack.c.bf16 %v401_v13, %v400_v12  ;;  %v402_v18 = vld [vmem:[#allocation6 + $0x20] sm:$0xff]  ;;  %vm1106_vm7 = vcmask (!%p1743_p7), 1043459   ;;  %vm1109_vm8 = vcmask (!%p1743_p7), 1044484  }
  0xb5   : > { %vm385_vm1 = vcmp.ge.s32.totalorder %v3109_v2, 1  ;;  %vm386_vm2 = vcmp.ge.s32.totalorder %v3109_v2, 2  ;;  %2169 = vmatpush3.bf16.xpose.msra.mxu0 %v2168_v7  ;;  %v2195_v17 = vpack.c.bf16 %v417_v15, %v416_v14  ;;  %v403_v19 = vld [vmem:[#allocation6 + $0x28] sm:$0xff]  ;;  %v418_v20 = vld [vmem:[#allocation6 + $0xa0] sm:$0xff]  ;;  %v404_v24 = vld [vmem:[#allocation6 + $0x30] sm:$0xff]  ;;  %vm1112_vm9 = vcmask (!%p1743_p7), 1045509  }
  0xb6   : > { %vm3117_vm4 = vmand %vm386_vm2, %vm388_vm3  ;;  %2193 = vmatpush3.bf16.xpose.msra.mxu1 %v2192_v11  ;;  %2170 = vmatprep.subr.bf16.mxu0 %v2813_v1  ;;  %v419_v21 = vld [vmem:[#allocation6 + $0xa8] sm:$0xff]  ;;  %v2174_v22 = vpack.c.bf16 %v403_v19, %v402_v18  ;;  %v405_v25 = vld [vmem:[#allocation6 + $0x38] sm:$0xff]  ;;  %vm1115_vm10 = vcmask (!%p1743_p7), 1046534   ;;  %vm1118_vm11 = vcmask (!%p1743_p7), 1047559   ;;  %vm1090_vm12 = vcmp.lt.s32.totalorder (!%p1743_p7), %v3109_v2, 2 }
  0xb7   : > { %2194 = vmatprep.subr.bf16.mxu1 %v2813_v1  ;;  %v2198_v23 = vpack.c.bf16 %v419_v21, %v418_v20  ;;  %v420_v26 = vld [vmem:[#allocation6 + $0xb0] sm:$0xff]  ;;  %v421_v27 = vld [vmem:[#allocation6 + $0xb8] sm:$0xff]  ;;  %v2177_v28 = vpack.c.bf16 %v405_v25, %v404_v24  ;;  %v406_v30 = vld [vmem:[#allocation6 + $0x40] sm:$0xff] }
  0xb8   : > { %v2201_v29 = vpack.c.bf16 %v421_v27, %v420_v26  ;;  %v407_v31 = vld [vmem:[#allocation6 + $0x48] sm:$0xff]  ;;  %v422_v32 = vld [vmem:[#allocation6 + $0xc0] sm:$0xff]  ;;  %v408_v36 = vld [vmem:[#allocation6 + $0x50] sm:$0xff] }
  0xb9   : > { %v423_v33 = vld [vmem:[#allocation6 + $0xc8] sm:$0xff]  ;;  %v2180_v34 = vpack.c.bf16 %v407_v31, %v406_v30  ;;  %v409_v37 = vld [vmem:[#allocation6 + $0x58] sm:$0xff]  ;;  %v424_v38 = vld [vmem:[#allocation6 + $0xd0] sm:$0xff] }
  0xba   : > { %v2204_v35 = vpack.c.bf16 %v423_v33, %v422_v32  ;;  %v425_v39 = vld [vmem:[#allocation6 + $0xd8] sm:$0xff]  ;;  %v2183_v40 = vpack.c.bf16 %v409_v37, %v408_v36  ;;  %v410_v42 = vld [vmem:[#allocation6 + $0x60] sm:$0xff]  ;;  %v411_v43 = vld [vmem:[#allocation6 + $0x68] sm:$0xff] }
  0xbb   : > { %v2207_v41 = vpack.c.bf16 %v425_v39, %v424_v38  ;;  %v426_v44 = vld [vmem:[#allocation6 + $0xe0] sm:$0xff]  ;;  %v427_v45 = vld [vmem:[#allocation6 + $0xe8] sm:$0xff]  ;;  %v2186_v46 = vpack.c.bf16 %v411_v43, %v410_v42  ;;  %v412_v48 = vld [vmem:[#allocation6 + $0x70] sm:$0xff] }
  0xbc   : > { %v2210_v47 = vpack.c.bf16 %v427_v45, %v426_v44  ;;  %v413_v49 = vld [vmem:[#allocation6 + $0x78] sm:$0xff]  ;;  %v428_v50 = vld [vmem:[#allocation6 + $0xf0] sm:$0xff]  ;;  %v430_v54 = vld [vmem:[#allocation6 + $0x100] sm:$0xff] }
  0xbd   : > { %2172 = vmatpush3.bf16.xpose.msra.mxu0 %v2171_v16  ;;  %v429_v51 = vld [vmem:[#allocation6 + $0xf8] sm:$0xff]  ;;  %v2189_v52 = vpack.c.bf16 %v413_v49, %v412_v48  ;;  %v431_v55 = vld [vmem:[#allocation6 + $0x108] sm:$0xff]  ;;  %v446_v56 = vld [vmem:[#allocation6 + $0x180] sm:$0xff] }
  0xbe   : > { %2196 = vmatpush3.bf16.xpose.msra.mxu1 %v2195_v17  ;;  %2173 = vmatprep.subr.bf16.mxu0 %v2813_v1  ;;  %v2213_v53 = vpack.c.bf16 %v429_v51, %v428_v50  ;;  %v447_v57 = vld [vmem:[#allocation6 + $0x188] sm:$0xff]  ;;  %v390_v58 = vld [vmem:[%s3089_s9] sm:$0xff]  ;;  %v2216_v59 = vpack.c.bf16 %v431_v55, %v430_v54  ;;  %v432_v62 = vld [vmem:[#allocation6 + $0x110] sm:$0xff] }
  0xbf   : > { %2197 = vmatprep.subr.bf16.mxu1 %v2813_v1  ;;  %v391_v60 = vld [vmem:[%s3089_s9 + $0x8] sm:$0xff]  ;;  %v2240_v61 = vpack.c.bf16 %v447_v57, %v446_v56  ;;  %v433_v63 = vld [vmem:[#allocation6 + $0x118] sm:$0xff]  ;;  %v448_v0 = vld [vmem:[#allocation6 + $0x190] sm:$0xff] }
  0xc0   : > { %v449_v4 = vld [vmem:[#allocation6 + $0x198] sm:$0xff]  ;;  %v2219_v5 = vpack.c.bf16 %v433_v63, %v432_v62  ;;  %v434_v7 = vld [vmem:[#allocation6 + $0x120] sm:$0xff]  ;;  %v435_v8 = vld [vmem:[#allocation6 + $0x128] sm:$0xff] }
  0xc1   : > { %v2243_v6 = vpack.c.bf16 %v449_v4, %v448_v0  ;;  %v450_v9 = vld [vmem:[#allocation6 + $0x1a0] sm:$0xff]  ;;  %v451_v11 = vld [vmem:[#allocation6 + $0x1a8] sm:$0xff]  ;;  %v2222_v12 = vpack.c.bf16 %v435_v8, %v434_v7  ;;  %v436_v14 = vld [vmem:[#allocation6 + $0x130] sm:$0xff] }
  0xc2   : > { %v2246_v13 = vpack.c.bf16 %v451_v11, %v450_v9  ;;  %v437_v15 = vld [vmem:[#allocation6 + $0x138] sm:$0xff]  ;;  %v452_v16 = vld [vmem:[#allocation6 + $0x1b0] sm:$0xff]  ;;  %v438_v20 = vld [vmem:[#allocation6 + $0x140] sm:$0xff] }
  0xc3   : > { %v453_v17 = vld [vmem:[#allocation6 + $0x1b8] sm:$0xff]  ;;  %v2225_v18 = vpack.c.bf16 %v437_v15, %v436_v14  ;;  %v439_v21 = vld [vmem:[#allocation6 + $0x148] sm:$0xff]  ;;  %v440_v26 = vld [vmem:[#allocation6 + $0x150] sm:$0xff] }
  0xc4   : > { %v2249_v19 = vpack.c.bf16 %v453_v17, %v452_v16  ;;  %v2228_v24 = vpack.c.bf16 %v439_v21, %v438_v20  ;;  %v441_v27 = vld [vmem:[#allocation6 + $0x158] sm:$0xff]  ;;  %v442_v32 = vld [vmem:[#allocation6 + $0x160] sm:$0xff]  ;;  %v443_v33 = vld [vmem:[#allocation6 + $0x168] sm:$0xff] }
  0xc5   : > { %2175 = vmatpush3.bf16.xpose.msra.mxu0 %v2174_v22  ;;  %v454_v22 = vld [vmem:[#allocation6 + $0x1c0] sm:$0xff]  ;;  %v2231_v30 = vpack.c.bf16 %v441_v27, %v440_v26  ;;  %v2234_v36 = vpack.c.bf16 %v443_v33, %v442_v32  ;;  %v444_v38 = vld [vmem:[#allocation6 + $0x170] sm:$0xff]  ;;  %v445_v39 = vld [vmem:[#allocation6 + $0x178] sm:$0xff] }
  0xc6   : > { %2199 = vmatpush3.bf16.xpose.msra.mxu1 %v2198_v23  ;;  %2176 = vmatprep.subr.bf16.mxu0 %v2813_v1  ;;  %v455_v23 = vld [vmem:[#allocation6 + $0x1c8] sm:$0xff]  ;;  %v2237_v42 = vpack.c.bf16 %v445_v39, %v444_v38  ;;  %v462_v44 = vld [vmem:[#allocation6 + $0x200] sm:$0xff]  ;;  %v392_v48 = vld [vmem:[%s3089_s9 + $0x10] sm:$0xff] }
  0xc7   : > { %2200 = vmatprep.subr.bf16.mxu1 %v2813_v1  ;;  %v2252_v25 = vpack.c.bf16 %v455_v23, %v454_v22  ;;  %v463_v45 = vld [vmem:[#allocation6 + $0x208] sm:$0xff]  ;;  %v393_v50 = vld [vmem:[%s3089_s9 + $0x18] sm:$0xff]  ;;  %v480_v54 = vld [vmem:[#allocation6 + $0x290] sm:$0xff] }
  0xc8   : > { %v2264_v49 = vpack.c.bf16 %v463_v45, %v462_v44  ;;  %v481_v55 = vld [vmem:[#allocation6 + $0x298] sm:$0xff]  ;;  %v468_v0 = vld [vmem:[#allocation6 + $0x230] sm:$0xff]  ;;  %v470_v9 = vld [vmem:[#allocation6 + $0x240] sm:$0xff] }
  0xc9   : > { %v2291_v57 = vpack.c.bf16 %v481_v55, %v480_v54  ;;  %v469_v4 = vld [vmem:[#allocation6 + $0x238] sm:$0xff]  ;;  %v471_v11 = vld [vmem:[#allocation6 + $0x248] sm:$0xff]  ;;  %v472_v16 = vld [vmem:[#allocation6 + $0x250] sm:$0xff] }
  0xca   : > { %v2273_v7 = vpack.c.bf16 %v469_v4, %v468_v0  ;;  %v2276_v14 = vpack.c.bf16 %v471_v11, %v470_v9  ;;  %v473_v17 = vld [vmem:[#allocation6 + $0x258] sm:$0xff]  ;;  %v474_v22 = vld [vmem:[#allocation6 + $0x260] sm:$0xff]  ;;  %v475_v23 = vld [vmem:[#allocation6 + $0x268] sm:$0xff] }
  0xcb   : > { %v2279_v20 = vpack.c.bf16 %v473_v17, %v472_v16  ;;  %v2282_v26 = vpack.c.bf16 %v475_v23, %v474_v22  ;;  %v394_v38 = vld [vmem:[%s3089_s9 + $0x20] sm:$0xff]  ;;  %v512_v44 = vld [vmem:[#allocation6 + $0x390] sm:$0xff]  ;;  %v513_v45 = vld [vmem:[#allocation6 + $0x398] sm:$0xff] }
  0xcc   : > { %v500_v54 = vld [vmem:[#allocation6 + $0x330] sm:$0xff]  ;;  %v506_v11 = vld [vmem:[#allocation6 + $0x360] sm:$0xff] }
  0xcd   : > { %2178 = vmatpush3.bf16.xpose.msra.mxu0 %v2177_v28  ;;  %v456_v28 = vld [vmem:[#allocation6 + $0x1d0] sm:$0xff] }
  0xce   : > { %2202 = vmatpush3.bf16.xpose.msra.mxu1 %v2201_v29  ;;  %2179 = vmatprep.subr.bf16.mxu0 %v2813_v1  ;;  %v457_v29 = vld [vmem:[#allocation6 + $0x1d8] sm:$0xff]  ;;  %v516_v55 = vld [vmem:[#allocation6 + $0x3b0] sm:$0xff] }
  0xcf   : > { %2203 = vmatprep.subr.bf16.mxu1 %v2813_v1  ;;  %v2255_v31 = vpack.c.bf16 %v457_v29, %v456_v28  ;;  %v476_v28 = vld [vmem:[#allocation6 + $0x270] sm:$0xff]  ;;  %v477_v29 = vld [vmem:[#allocation6 + $0x278] sm:$0xff] }
  0xd0   : > { %v2285_v32 = vpack.c.bf16 %v477_v29, %v476_v28  ;;  %v504_v4 = vld [vmem:[#allocation6 + $0x350] sm:$0xff] }
  0xd1   : > { %v508_v17 = vld [vmem:[#allocation6 + $0x370] sm:$0xff] }
  0xd2   : > { %v396_v23 = vld [vmem:[%s3089_s9 + $0x30] sm:$0xff] }
  0xd5   : > { %2181 = vmatpush3.bf16.xpose.msra.mxu0 %v2180_v34  ;;  %v458_v34 = vld [vmem:[#allocation6 + $0x1e0] sm:$0xff] }
  0xd6   : > { %2205 = vmatpush3.bf16.xpose.msra.mxu1 %v2204_v35  ;;  %2182 = vmatprep.subr.bf16.mxu0 %v2813_v1  ;;  %v459_v35 = vld [vmem:[#allocation6 + $0x1e8] sm:$0xff] }
  0xd7   : > { %2206 = vmatprep.subr.bf16.mxu1 %v2813_v1  ;;  %v2258_v37 = vpack.c.bf16 %v459_v35, %v458_v34  ;;  %v494_v34 = vld [vmem:[#allocation6 + $0x300] sm:$0xff]  ;;  %v495_v35 = vld [vmem:[#allocation6 + $0x308] sm:$0xff] }
  0xd8   : > { %v2312_v39 = vpack.c.bf16 %v495_v35, %v494_v34 }
  0xdd   : > { %2184 = vmatpush3.bf16.xpose.msra.mxu0 %v2183_v40  ;;  %v460_v40 = vld [vmem:[#allocation6 + $0x1f0] sm:$0xff] }
  0xde   : > { %2208 = vmatpush3.bf16.xpose.msra.mxu1 %v2207_v41  ;;  %2185 = vmatprep.subr.bf16.mxu0 %v2813_v1  ;;  %v461_v41 = vld [vmem:[#allocation6 + $0x1f8] sm:$0xff] }
  0xdf   : > { %2209 = vmatprep.subr.bf16.mxu1 %v2813_v1  ;;  %v2261_v43 = vpack.c.bf16 %v461_v41, %v460_v40  ;;  %v395_v40 = vld [vmem:[%s3089_s9 + $0x28] sm:$0xff] }
  0xe5   : > { %2187 = vmatpush3.bf16.xpose.msra.mxu0 %v2186_v46  ;;  %v478_v46 = vld [vmem:[#allocation6 + $0x280] sm:$0xff] }
  0xe6   : > { %2211 = vmatpush3.bf16.xpose.msra.mxu1 %v2210_v47  ;;  %2188 = vmatprep.subr.bf16.mxu0 %v2813_v1  ;;  %v479_v47 = vld [vmem:[#allocation6 + $0x288] sm:$0xff] }
  0xe7   : > { %2212 = vmatprep.subr.bf16.mxu1 %v2813_v1  ;;  %v2288_v51 = vpack.c.bf16 %v479_v47, %v478_v46  ;;  %v2339_v47 = vpack.c.bf16 %v513_v45, %v512_v44 }
  0xed   : > { %2190 = vmatpush3.bf16.xpose.msra.mxu0 %v2189_v52  ;;  %v464_v52 = vld [vmem:[#allocation6 + $0x210] sm:$0xff] }
  0xee   : > { %2214 = vmatpush3.bf16.xpose.msra.mxu1 %v2213_v53  ;;  %2215 = vmatprep.subr.bf16.mxu0 %v2813_v1  ;;  %v465_v53 = vld [vmem:[#allocation6 + $0x218] sm:$0xff] }
  0xef   : > { %2239 = vmatprep.subr.bf16.mxu1 %v2813_v1  ;;  %v2267_v56 = vpack.c.bf16 %v465_v53, %v464_v52 }
  0xf4   : > { %1920 = vmatmul.mubr.f32.vlgmr.msra.gmra.mrb[0].mxu0 %v390_v58  ;;  %v466_v58 = vld [vmem:[#allocation6 + $0x220] sm:$0xff] }
  0xf5   : > { %1955 = vmatmul.mubr.f32.vlgmr.msra.gmra.mrb[0].mxu1 %v391_v60  ;;  %2217 = vmatpush3.bf16.xpose.msra.mxu0 %v2216_v59  ;;  %v467_v59 = vld [vmem:[#allocation6 + $0x228] sm:$0xff]  ;;  %v482_v60 = vld [vmem:[#allocation6 + $0x2a0] sm:$0xff] }
  0xf6   : > { %2241 = vmatpush3.bf16.xpose.msra.mxu1 %v2240_v61  ;;  %2218 = vmatprep.subr.bf16.mxu0 %v2813_v1  ;;  %v483_v61 = vld [vmem:[#allocation6 + $0x2a8] sm:$0xff]  ;;  %v2270_v62 = vpack.c.bf16 %v467_v59, %v466_v58  ;;  %v502_v59 = vld [vmem:[#allocation6 + $0x340] sm:$0xff] }
  0xf7   : > { %2242 = vmatprep.subr.bf16.mxu1 %v2813_v1  ;;  %1989 = vmatprep.mubr.msk.f32.mxu0 %vm2814_vm0, %v2815_v3  ;;  %v2294_v63 = vpack.c.bf16 %v483_v61, %v482_v60  ;;  %v503_v60 = vld [vmem:[#allocation6 + $0x348] sm:$0xff]  ;;  %v518_v61 = vld [vmem:[#allocation6 + $0x3c0] sm:$0xff] }
  0xf8   : > { %2024 = vmatprep.mubr.msk.f32.mxu1 %vm2814_vm0, %v2815_v3 }
  0xfd   : > { %2220 = vmatpush3.bf16.xpose.msra.mxu0 %v2219_v5  ;;  %v484_v5 = vld [vmem:[#allocation6 + $0x2b0] sm:$0xff] }
  0xfe   : > { %2244 = vmatpush3.bf16.xpose.msra.mxu1 %v2243_v6  ;;  %2221 = vmatprep.subr.bf16.mxu0 %v2813_v1  ;;  %v485_v6 = vld [vmem:[#allocation6 + $0x2b8] sm:$0xff] }
  0xff   : > { %2245 = vmatprep.subr.bf16.mxu1 %v2813_v1  ;;  %v2297_v8 = vpack.c.bf16 %v485_v6, %v484_v5  ;;  %v505_v5 = vld [vmem:[#allocation6 + $0x358] sm:$0xff]  ;;  %v520_v6 = vld [vmem:[#allocation6 + $0x3d0] sm:$0xff] }
 0x105   : > { %2223 = vmatpush3.bf16.xpose.msra.mxu0 %v2222_v12  ;;  %v486_v12 = vld [vmem:[#allocation6 + $0x2c0] sm:$0xff] }
 0x106   : > { %2247 = vmatpush3.bf16.xpose.msra.mxu1 %v2246_v13  ;;  %2224 = vmatprep.subr.bf16.mxu0 %v2813_v1  ;;  %v487_v13 = vld [vmem:[#allocation6 + $0x2c8] sm:$0xff] }
 0x107   : > { %2248 = vmatprep.subr.bf16.mxu1 %v2813_v1  ;;  %v2300_v15 = vpack.c.bf16 %v487_v13, %v486_v12  ;;  %v507_v12 = vld [vmem:[#allocation6 + $0x368] sm:$0xff]  ;;  %v522_v13 = vld [vmem:[#allocation6 + $0x3e0] sm:$0xff] }
 0x10d   : > { %2226 = vmatpush3.bf16.xpose.msra.mxu0 %v2225_v18  ;;  %v488_v18 = vld [vmem:[#allocation6 + $0x2d0] sm:$0xff] }
 0x10e   : > { %2250 = vmatpush3.bf16.xpose.msra.mxu1 %v2249_v19  ;;  %2227 = vmatprep.subr.bf16.mxu0 %v2813_v1  ;;  %v489_v19 = vld [vmem:[#allocation6 + $0x2d8] sm:$0xff] }
 0x10f   : > { %2251 = vmatprep.subr.bf16.mxu1 %v2813_v1  ;;  %v2303_v21 = vpack.c.bf16 %v489_v19, %v488_v18  ;;  %v509_v18 = vld [vmem:[#allocation6 + $0x378] sm:$0xff]  ;;  %v524_v19 = vld [vmem:[#allocation6 + $0x3f0] sm:$0xff] }
 0x115   : > { %2229 = vmatpush3.bf16.xpose.msra.mxu0 %v2228_v24  ;;  %v490_v24 = vld [vmem:[#allocation6 + $0x2e0] sm:$0xff] }
 0x116   : > { %2253 = vmatpush3.bf16.xpose.msra.mxu1 %v2252_v25  ;;  %2230 = vmatprep.subr.bf16.mxu0 %v2813_v1  ;;  %v491_v25 = vld [vmem:[#allocation6 + $0x2e8] sm:$0xff] }
 0x117   : > { %2254 = vmatprep.subr.bf16.mxu1 %v2813_v1  ;;  %v2306_v27 = vpack.c.bf16 %v491_v25, %v490_v24  ;;  %v397_v24 = vld [vmem:[%s3089_s9 + $0x38] sm:$0xff] }
 0x11d   : > { %2232 = vmatpush3.bf16.xpose.msra.mxu0 %v2231_v30  ;;  %v492_v30 = vld [vmem:[#allocation6 + $0x2f0] sm:$0xff] }
 0x11e   : > { %2256 = vmatpush3.bf16.xpose.msra.mxu1 %v2255_v31  ;;  %2233 = vmatprep.subr.bf16.mxu0 %v2813_v1  ;;  %v493_v31 = vld [vmem:[#allocation6 + $0x2f8] sm:$0xff] }
 0x11f   : > { %2257 = vmatprep.subr.bf16.mxu1 %v2813_v1  ;;  %v2309_v33 = vpack.c.bf16 %v493_v31, %v492_v30 }
 0x125   : > { %2235 = vmatpush3.bf16.xpose.msra.mxu0 %v2234_v36  ;;  %v510_v36 = vld [vmem:[#allocation6 + $0x380] sm:$0xff] }
 0x126   : > { %2259 = vmatpush3.bf16.xpose.msra.mxu1 %v2258_v37  ;;  %2236 = vmatprep.subr.bf16.mxu0 %v2813_v1  ;;  %v511_v37 = vld [vmem:[#allocation6 + $0x388] sm:$0xff] }
 0x127   : > { %2260 = vmatprep.subr.bf16.mxu1 %v2813_v1  ;;  %v2336_v41 = vpack.c.bf16 %v511_v37, %v510_v36 }
 0x12d   : > { %2238 = vmatpush3.bf16.xpose.msra.mxu0 %v2237_v42  ;;  %v496_v42 = vld [vmem:[#allocation6 + $0x310] sm:$0xff] }
 0x12e   : > { %2262 = vmatpush3.bf16.xpose.msra.mxu1 %v2261_v43  ;;  %2263 = vmatprep.subr.bf16.mxu0 %v2813_v1  ;;  %v497_v43 = vld [vmem:[#allocation6 + $0x318] sm:$0xff] }
 0x12f   : > { %2287 = vmatprep.subr.bf16.mxu1 %v2813_v1  ;;  %v2315_v46 = vpack.c.bf16 %v497_v43, %v496_v42 }
 0x134   : > { %1990 = vmatmul.mubr.f32.vlgmr.msra.gmra.mrb[2].mxu0 %v392_v48  ;;  %v498_v48 = vld [vmem:[#allocation6 + $0x320] sm:$0xff] }
 0x135   : > { %2025 = vmatmul.mubr.f32.vlgmr.msra.gmra.mrb[2].mxu1 %v393_v50  ;;  %2265 = vmatpush3.bf16.xpose.msra.mxu0 %v2264_v49  ;;  %v499_v49 = vld [vmem:[#allocation6 + $0x328] sm:$0xff]  ;;  %v514_v50 = vld [vmem:[#allocation6 + $0x3a0] sm:$0xff] }
 0x136   : > { %2289 = vmatpush3.bf16.xpose.msra.mxu1 %v2288_v51  ;;  %2266 = vmatprep.subr.bf16.mxu0 %v2813_v1  ;;  %v515_v51 = vld [vmem:[#allocation6 + $0x3a8] sm:$0xff]  ;;  %v2318_v52 = vpack.c.bf16 %v499_v49, %v498_v48 }
 0x137   : > { %2290 = vmatprep.subr.bf16.mxu1 %v2813_v1  ;;  %2059 = vmatprep.mubr.msk.f32.mxu0 %vm2814_vm0, %v2815_v3  ;;  %v2342_v53 = vpack.c.bf16 %v515_v51, %v514_v50 }
 0x138   : > { %2094 = vmatprep.mubr.msk.f32.mxu1 %vm2814_vm0, %v2815_v3 }
 0x13d   : > { %2268 = vmatpush3.bf16.xpose.msra.mxu0 %v2267_v56  ;;  %v517_v56 = vld [vmem:[#allocation6 + $0x3b8] sm:$0xff] }
 0x13e   : > { %2292 = vmatpush3.bf16.xpose.msra.mxu1 %v2291_v57  ;;  %2269 = vmatprep.subr.bf16.mxu0 %v2813_v1  ;;  %v2345_v58 = vpack.c.bf16 %v517_v56, %v516_v55 }
 0x13f   : > { %2293 = vmatprep.subr.bf16.mxu1 %v2813_v1 }
 0x145   : > { %2271 = vmatpush3.bf16.xpose.msra.mxu0 %v2270_v62  ;;  %v519_v62 = vld [vmem:[#allocation6 + $0x3c8] sm:$0xff] }
 0x146   : > { %2295 = vmatpush3.bf16.xpose.msra.mxu1 %v2294_v63  ;;  %2272 = vmatprep.subr.bf16.mxu0 %v2813_v1  ;;  %v2324_v63 = vpack.c.bf16 %v503_v60, %v502_v59  ;;  %v2348_v0 = vpack.c.bf16 %v519_v62, %v518_v61 }
 0x147   : > { %2296 = vmatprep.subr.bf16.mxu1 %v2813_v1 }
 0x14d   : > { %2274 = vmatpush3.bf16.xpose.msra.mxu0 %v2273_v7  ;;  %v521_v7 = vld [vmem:[#allocation6 + $0x3d8] sm:$0xff] }
 0x14e   : > { %2298 = vmatpush3.bf16.xpose.msra.mxu1 %v2297_v8  ;;  %2275 = vmatprep.subr.bf16.mxu0 %v2813_v1  ;;  %v2327_v8 = vpack.c.bf16 %v505_v5, %v504_v4  ;;  %v2351_v9 = vpack.c.bf16 %v521_v7, %v520_v6 }
 0x14f   : > { %2299 = vmatprep.subr.bf16.mxu1 %v2813_v1 }
 0x155   : > { %2277 = vmatpush3.bf16.xpose.msra.mxu0 %v2276_v14  ;;  %v523_v14 = vld [vmem:[#allocation6 + $0x3e8] sm:$0xff] }
 0x156   : > { %2301 = vmatpush3.bf16.xpose.msra.mxu1 %v2300_v15  ;;  %2278 = vmatprep.subr.bf16.mxu0 %v2813_v1  ;;  %v2330_v15 = vpack.c.bf16 %v507_v12, %v506_v11  ;;  %v2354_v16 = vpack.c.bf16 %v523_v14, %v522_v13 }
 0x157   : > { %2302 = vmatprep.subr.bf16.mxu1 %v2813_v1 }
 0x15d   : > { %2280 = vmatpush3.bf16.xpose.msra.mxu0 %v2279_v20  ;;  %v525_v20 = vld [vmem:[#allocation6 + $0x3f8] sm:$0xff] }
 0x15e   : > { %2304 = vmatpush3.bf16.xpose.msra.mxu1 %v2303_v21  ;;  %2281 = vmatprep.subr.bf16.mxu0 %v2813_v1  ;;  %v2333_v21 = vpack.c.bf16 %v509_v18, %v508_v17  ;;  %v2357_v22 = vpack.c.bf16 %v525_v20, %v524_v19 }
 0x15f   : > { %2305 = vmatprep.subr.bf16.mxu1 %v2813_v1 }
 0x165   : > { %2283 = vmatpush3.bf16.xpose.msra.mxu0 %v2282_v26 }
 0x166   : > { %2307 = vmatpush3.bf16.xpose.msra.mxu1 %v2306_v27  ;;  %2284 = vmatprep.subr.bf16.mxu0 %v2813_v1 }
 0x167   : > { %2308 = vmatprep.subr.bf16.mxu1 %v2813_v1 }
 0x16d   : > { %2286 = vmatpush3.bf16.xpose.msra.mxu0 %v2285_v32 }
 0x16e   : > { %2310 = vmatpush3.bf16.xpose.msra.mxu1 %v2309_v33  ;;  %2311 = vmatprep.subr.bf16.mxu0 %v2813_v1 }
 0x16f   : > { %2335 = vmatprep.subr.bf16.mxu1 %v2813_v1 }
 0x174   : > { %2060 = vmatmul.mubr.f32.vlgmr.msra.gmra.mrb[4].mxu0 %v394_v38 }
 0x175   : > { %2095 = vmatmul.mubr.f32.vlgmr.msra.gmra.mrb[4].mxu1 %v395_v40  ;;  %2313 = vmatpush3.bf16.xpose.msra.mxu0 %v2312_v39 }
 0x176   : > { %2337 = vmatpush3.bf16.xpose.msra.mxu1 %v2336_v41  ;;  %2314 = vmatprep.subr.bf16.mxu0 %v2813_v1 }
 0x177   : > { %2338 = vmatprep.subr.bf16.mxu1 %v2813_v1  ;;  %2129 = vmatprep.mubr.msk.f32.mxu0 %vm2814_vm0, %v2815_v3 }
 0x178   : > { %2164 = vmatprep.mubr.msk.f32.mxu1 %vm2814_vm0, %v2815_v3  ;;  %v501_v3 = vld [vmem:[#allocation6 + $0x338] sm:$0xff] }
 0x179   : > { %v2321_v57 = vpack.c.bf16 %v501_v3, %v500_v54 }
 0x17d   : > { %2316 = vmatpush3.bf16.xpose.msra.mxu0 %v2315_v46 }
 0x17e   : > { %2340 = vmatpush3.bf16.xpose.msra.mxu1 %v2339_v47  ;;  %2317 = vmatprep.subr.bf16.mxu0 %v2813_v1 }
 0x17f   : > { %2341 = vmatprep.subr.bf16.mxu1 %v2813_v1 }
 0x185   : > { %2319 = vmatpush3.bf16.xpose.msra.mxu0 %v2318_v52 }
 0x186   : > { %2343 = vmatpush3.bf16.xpose.msra.mxu1 %v2342_v53  ;;  %2320 = vmatprep.subr.bf16.mxu0 %v2813_v1 }
 0x187   : > { %2344 = vmatprep.subr.bf16.mxu1 %v2813_v1 }
 0x18d   : > { %2322 = vmatpush3.bf16.xpose.msra.mxu0 %v2321_v57 }
 0x18e   : > { %2346 = vmatpush3.bf16.xpose.msra.mxu1 %v2345_v58  ;;  %2323 = vmatprep.subr.bf16.mxu0 %v2813_v1 }
 0x18f   : > { %2347 = vmatprep.subr.bf16.mxu1 %v2813_v1 }
 0x195   : > { %2325 = vmatpush3.bf16.xpose.msra.mxu0 %v2324_v63 }
 0x196   : > { %2349 = vmatpush3.bf16.xpose.msra.mxu1 %v2348_v0  ;;  %2326 = vmatprep.subr.bf16.mxu0 %v2813_v1 }
 0x197   : > { %2350 = vmatprep.subr.bf16.mxu1 %v2813_v1 }
 0x19d   : > { %2328 = vmatpush3.bf16.xpose.msra.mxu0 %v2327_v8 }
 0x19e   : > { %2352 = vmatpush3.bf16.xpose.msra.mxu1 %v2351_v9  ;;  %2329 = vmatprep.subr.bf16.mxu0 %v2813_v1 }
 0x19f   : > { %2353 = vmatprep.subr.bf16.mxu1 %v2813_v1 }
 0x1a5   : > { %2331 = vmatpush3.bf16.xpose.msra.mxu0 %v2330_v15 }
 0x1a6   : > { %2355 = vmatpush3.bf16.xpose.msra.mxu1 %v2354_v16  ;;  %2332 = vmatprep.subr.bf16.mxu0 %v2813_v1 }
 0x1a7   : > { %2356 = vmatprep.subr.bf16.mxu1 %v2813_v1 }
 0x1ad   : > { %2334 = vmatpush3.bf16.xpose.msra.mxu0 %v2333_v21 }
 0x1ae   : > { %2358 = vmatpush3.bf16.xpose.msra.mxu1 %v2357_v22 }
 0x1b4   : > { %2130 = vmatmul.mubr.f32.vlgmr.msra.gmra.mrb[6].mxu0 %v396_v23 }
 0x1b5   : > { %2165 = vmatmul.mubr.f32.vlgmr.msra.gmra.mrb[6].mxu1 %v397_v24 }
 0x1c7   : > { %v3203_v25 = vpop.f32.mrb[0].mxu0 }
 0x1c8   : > { %v3205_v26 = vpop.f32.mrb[0].mxu1  ;;  %v1921_v27 = vpop.f32.mrb[1].mxu0 }
 0x1c9   : > { %v1956_v28 = vpop.f32.mrb[1].mxu1  ;;  %v1099_v40 = vrot.slane (!%p1743_p7), %v3205_v26, 7 }
 0x1cb   : > { %v1101_v44 = vsel (!%p1743_p7), %vm1100_vm5, %v1099_v40, %v3203_v25 }
 0x207   : > { %v3207_v29 = vpop.f32.mrb[2].mxu0 }
 0x208   : > { %v3209_v30 = vpop.f32.mrb[2].mxu1  ;;  %v1991_v1 = vpop.f32.mrb[3].mxu0  ;;  %v1102_v41 = vrot.slane (!%p1743_p7), %v3207_v29, 6 }
 0x209   : > { %v2026_v31 = vpop.f32.mrb[3].mxu1  ;;  %v1105_v42 = vrot.slane (!%p1743_p7), %v3209_v30, 5 }
 0x20a   : > { %v1104_v46 = vsel (!%p1743_p7), %vm1103_vm6, %v1102_v41, %v1101_v44 }
 0x20b   : > { %v1107_v48 = vsel (!%p1743_p7), %vm1106_vm7, %v1105_v42, %v1104_v46 }
 0x247   : > { %v3211_v32 = vpop.f32.mrb[4].mxu0 }
 0x248   : > { %v3213_v33 = vpop.f32.mrb[4].mxu1  ;;  %v2061_v34 = vpop.f32.mrb[5].mxu0  ;;  %v1108_v43 = vrot.slane (!%p1743_p7), %v3211_v32, 4 }
 0x249   : > { %v2096_v35 = vpop.f32.mrb[5].mxu1  ;;  %v1111_v45 = vrot.slane (!%p1743_p7), %v3213_v33, 3 }
 0x24a   : > { %v1110_v50 = vsel (!%p1743_p7), %vm1109_vm8, %v1108_v43, %v1107_v48 }
 0x24b   : > { %v1113_v51 = vsel (!%p1743_p7), %vm1112_vm9, %v1111_v45, %v1110_v50 }
 0x283   : > { %1089 = sbr.rel (%p1743_p7) target bundleno = 654 (0x28e), region = 72 }
 0x287   : > { %v3215_v36 = vpop.f32.mrb[6].mxu0 }
 0x288   : > { %v3217_v37 = vpop.f32.mrb[6].mxu1  ;;  %v2131_v38 = vpop.f32.mrb[7].mxu0  ;;  %v1114_v47 = vrot.slane (!%p1743_p7), %v3215_v36, 2 }
 0x289   : > { %v2166_v39 = vpop.f32.mrb[7].mxu1  ;;  %v1117_v49 = vrot.slane (!%p1743_p7), %v3217_v37, 1 }
 0x28a   : > { %v1116_v52 = vsel %vm1115_vm10, %v1114_v47, %v1113_v51 }
 0x28b   : > { %v1119_v53 = vsel %vm1118_vm11, %v1117_v49, %v1116_v52 }
 0x28c   : > { %v1121_v54 = vsel %vm1090_vm12, %v1119_v53, -1e+30 }
 0x28d   : > { %1122 = vst [vmem:[#allocation2] sm:$0xff] %v1121_v54 }
 0x28e PF: > { %s2816_s28 = smov 1   ;;  %v2817_v55 = vmov 0   ;;  %s3235_s29 = sshll.u32 %s2794_s24, 3  ;;  %v3237_v56 = vld [vmem:[#allocation9] sm:$0xff]  ;;  %v1155_v12 = vrot.slane %v3205_v26, 7  ;;  %vm1156_vm0 = vcmask 1041409  }
 0x28f   : > { %2482 = vset.pattern.permute.xlu1 %v2817_v55  ;;  %p1178_p9 = scmp.ge.s32.totalorder %s3235_s29, 1  ;;  %v1179_v57 = vstv %s3235_s29  ;;  %2483 = vset.pattern.permute.xlu0 %v2817_v55  ;;  %s2818_s12 = smov 2   ;;  %v1158_v13 = vrot.slane %v3207_v29, 6  ;;  %vm1159_vm2 = vcmask 1042434   ;;  %v1161_v17 = vrot.slane %v3209_v30, 5 }
 0x290   : > { %vm1180_vm13 = vcmp.lt.s32.totalorder %v1179_v57, %v3237_v56  ;;  %v1157_v14 = vsel %vm1156_vm0, %v1155_v12, %v3203_v25  ;;  %vm1162_vm3 = vcmask 1043459   ;;  %v1164_v21 = vrot.slane %v3211_v32, 4  ;;  %s1228_s20 = sadd.s32 1, %s3235_s29  ;;  %s1279_s11 = sadd.s32 2, %s3235_s29 }
 0x291   : > { %s1181_s30 = scalar_select %p1178_p9, 1, 0  ;;  %v1160_v19 = vsel %vm1159_vm2, %v1158_v13, %v1157_v14  ;;  %vm1165_vm5 = vcmask 1044484   ;;  %v1167_v23 = vrot.slane %v3213_v33, 3  ;;  %vm1168_vm6 = vcmask 1045509  }
 0x292   : > { %v1163_v22 = vsel %vm1162_vm3, %v1161_v17, %v1160_v19  ;;  %p1229_p4 = scmp.ge.s32.totalorder %s1228_s20, 1  ;;  %v1170_v27 = vrot.slane %v3215_v36, 2  ;;  %vm1171_vm7 = vcmask 1046534   ;;  %v1173_v1 = vrot.slane %v3217_v37, 1  ;;  %p1280_p5 = scmp.ge.s32.totalorder %s1279_s11, 1 }
 0x293   : > { %v1182_v58 = vstv %s1181_s30  ;;  %v1166_v24 = vsel %vm1165_vm5, %v1164_v21, %v1163_v22  ;;  %vm1174_vm8 = vcmask 1047559   ;;  %v1230_v35 = vstv %s1228_s20  ;;  %s1330_s15 = sadd.s32 3, %s3235_s29  ;;  %s1381_s13 = sadd.s32 4, %s3235_s29 }
 0x294   : > { %v3229_v3 = vld [vmem:[#allocation2] sm:$0xff]  ;;  %vm1183_vm14 = vcmp.eq.s32.totalorder %v1182_v58, 1  ;;  %v1169_v28 = vsel %vm1168_vm6, %v1167_v23, %v1166_v24  ;;  %s1232_s8 = scalar_select %p1229_p4, 1, 0  ;;  %vm1231_vm9 = vcmp.lt.s32.totalorder %v1230_v35, %v3237_v56  ;;  %v1222_v12 = vrot.slane %v3215_v36, 3 }
 0x295   : > { %1126 = vrot.lane.b32.xlu0 %v3229_v3, %s2816_s28  ;;  %vm1184_vm15 = vmand %vm1183_vm14, %vm1180_vm13  ;;  %v1172_v31 = vsel %vm1171_vm7, %v1170_v27, %v1169_v28  ;;  %s1283_s21 = scalar_select %p1280_p5, 1, 0  ;;  %v1224_v14 = vrot.slane %v3217_v37, 2  ;;  %v1281_v17 = vstv %s1279_s11  ;;  %v1332_v23 = vstv %s1330_s15 }
 0x296   : > { %v1185_v59 = vsel %vm1184_vm15, 1, %v2817_v55  ;;  %v1233_v38 = vstv %s1232_s8  ;;  %v1175_v41 = vsel %vm1174_vm8, %v1173_v1, %v1172_v31  ;;  %p3291_p12 = scmp.ge.s32.totalorder %s1330_s15, 1  ;;  %vm1282_vm13 = vcmp.lt.s32.totalorder %v1281_v17, %v3237_v56  ;;  %p1382_p13 = scmp.ge.s32.totalorder %s1381_s13, 1 }
 0x297   : > { %1187 = vperm.xlu1 %2482, %v1185_v59   ;;  %vm1234_vm10 = vcmp.eq.s32.totalorder %v1233_v38, 1  ;;  %v1212_v59 = vrot.slane %v3203_v25, 1  ;;  %s1432_s10 = sadd.s32 5, %s3235_s29  ;;  %s1483_s18 = sadd.s32 6, %s3235_s29 }
 0x298   : > { %vm1235_vm12 = vmand %vm1234_vm10, %vm1231_vm9  ;;  %s1334_s19 = scalar_select %p3291_p12, 1, 0  ;;  %vm1333_vm10 = vcmp.lt.s32.totalorder %v1332_v23, %v3237_v56 }
 0x299   : > { %1129 = vrot.lane.b32.xlu0 %v3229_v3, %s2818_s12  ;;  %v1236_v45 = vsel %vm1235_vm12, 1, %v2817_v55  ;;  %s1385_s14 = scalar_select %p1382_p13, 1, 0 }
 0x29a   : > { %v1335_v24 = vstv %s1334_s19  ;;  %p1433_p0 = scmp.ge.s32.totalorder %s1432_s10, 1  ;;  %p1484_p2 = scmp.ge.s32.totalorder %s1483_s18, 1 }
 0x29b   : > { %s1534_s30 = sadd.s32 7, %s3235_s29  ;;  %p1745_p10 = scmp.ne.s32.totalorder %s2794_s24, 1 }
 0x29c   : > { %s1436_s16 = scalar_select %p1433_p0, 1, 0 }
 0x29d   : > { %s1487_s9 = scalar_select %p1484_p2, 1, 0 }
 0x29e   : > { %p1535_p6 = scmp.ge.s32.totalorder %s1534_s30, 1 }
 0x2a0   : > { %s1538_s20 = scalar_select %p1535_p6, 1, 0 }
 0x307   : > { %v1127_v60 = vpop.permute.xlu0 %1126 }
 0x308   : > { %v1128_v61 = vsel %vm385_vm1, %v1127_v60, -1e+30  ;;  %v1214_v60 = vrot.slane %v3207_v29, 7 }
 0x309   : > { %v1132_v62 = vmax.f32 %v3229_v3, %v1128_v61  ;;  %v1133_v4 = vmin.f32 %v3229_v3, %v1128_v61  ;;  %v1213_v61 = vsel %vm1156_vm0, %v3205_v26, %v1212_v59 }
 0x30b   : > { %v1130_v63 = vpop.permute.xlu0 %1129 }
 0x30c   : > { %v1131_v0 = vsel %vm3117_vm4, %v1130_v63, -1e+30 }
 0x30d   : > { %v1134_v5 = vmax.f32 %v1132_v62, %v1131_v0  ;;  %v1135_v6 = vmin.f32 %v1132_v62, %v1131_v0  ;;  %v1216_v0 = vrot.slane %v3209_v30, 6 }
 0x30f   : > { %v1136_v7 = vsub.f32 %v1135_v6, %v1134_v5  ;;  %v1140_v8 = vsub.f32 %v1133_v4, %v1134_v5 }
 0x311   : > { %v1137_v9 = vmul.f32 1.442695, %v1136_v7  ;;  %v1141_v11 = vmul.f32 1.442695, %v1140_v8  ;;  %v1218_v7 = vrot.slane %v3211_v32, 5 }
 0x313   : > { %2484 = vpow2.f32 %v1137_v9  ;;  %v1220_v9 = vrot.slane %v3213_v33, 4 }
 0x314   : > { %2486 = vpow2.f32 %v1141_v11 }
 0x316   : > { %v1188_v40 = vpop.permute.xlu1 %1187 }
 0x317   : > { %vm1189_vm11 = vcmp.eq.s32.totalorder %v1188_v40, 1 }
 0x31d   : > { %v2485_v15 = vpop.eup %2484 }
 0x31e   : > { %v1139_v16 = vadd.f32 1.0, %v2485_v15  ;;  %v2487_v18 = vpop.eup %2486 }
 0x320   : > { %v1143_v20 = vadd.f32 %v2487_v18, %v1139_v16  ;;  %v1284_v18 = vstv %s1283_s21 }
 0x321   : > { %vm1285_vm14 = vcmp.eq.s32.totalorder %v1284_v18, 1 }
 0x322   : > { %2488 = vlog2.f32 %v1143_v20  ;;  %vm1286_vm9 = vmand %vm1285_vm14, %vm1282_vm13 }
 0x323   : > { %v1287_v1 = vsel %vm1286_vm9, 1, %v2817_v55 }
 0x32c   : > { %v2489_v34 = vpop.eup %2488 }
 0x32d   : > { %v1145_v39 = vmul.f32 0.6931472, %v2489_v34 }
 0x32f   : > { %v1146_v42 = vadd.f32 %v1145_v39, %v1134_v5  ;;  %v1215_v5 = vsel %vm1159_vm2, %v1214_v60, %v1213_v61  ;;  %v1271_v60 = vrot.slane %v3213_v33, 5 }
 0x330   : > { %v1217_v8 = vsel %vm1162_vm3, %v1216_v0, %v1215_v5  ;;  %v1275_v0 = vrot.slane %v3217_v37, 3 }
 0x331   : > { %v1177_v43 = vadd.f32 %v1175_v41, %v1146_v42  ;;  %v1219_v11 = vsel %vm1165_vm5, %v1218_v7, %v1217_v8 }
 0x332   : > { %v1221_v13 = vsel %vm1168_vm6, %v1220_v9, %v1219_v11 }
 0x333   : > { %v1190_v44 = vsel %vm1189_vm11, %v1177_v43, %v3229_v3  ;;  %v1223_v15 = vsel %vm1171_vm7, %v1222_v12, %v1221_v13  ;;  %vm1336_vm11 = vcmp.eq.s32.totalorder %v1335_v24, 1 }
 0x334   : > { %1194 = vrot.lane.b32.xlu0 %v1190_v44, %s2818_s12  ;;  %1191 = vrot.lane.b32.xlu1 %v1190_v44, %s2816_s28  ;;  %v1225_v20 = vsel %vm1174_vm8, %v1224_v14, %v1223_v15  ;;  %vm1337_vm12 = vmand %vm1336_vm11, %vm1333_vm10 }
 0x335   : > { %v1338_v31 = vsel %vm1337_vm12, 1, %v2817_v55 }
 0x338   : > { %1238 = vperm.xlu1 %2482, %v1236_v45  }
 0x3a6   : > { %v1195_v46 = vpop.permute.xlu0 %1194  ;;  %v1192_v47 = vpop.permute.xlu1 %1191 }
 0x3a7   : > { %v1193_v48 = vsel %vm385_vm1, %v1192_v47, -1e+30  ;;  %v1196_v50 = vsel %vm3117_vm4, %v1195_v46, -1e+30 }
 0x3a8   : > { %v1197_v49 = vmax.f32 %v1190_v44, %v1193_v48  ;;  %v1198_v51 = vmin.f32 %v1190_v44, %v1193_v48  ;;  %v1263_v48 = vrot.slane %v3203_v25, 2 }
 0x3aa   : > { %v1199_v52 = vmax.f32 %v1197_v49, %v1196_v50  ;;  %v1200_v53 = vmin.f32 %v1197_v49, %v1196_v50  ;;  %v1264_v49 = vrot.slane %v3205_v26, 1 }
 0x3ac   : > { %v1201_v54 = vsub.f32 %v1200_v53, %v1199_v52  ;;  %v1205_v3 = vsub.f32 %v1198_v51, %v1199_v52  ;;  %v1265_v50 = vsel %vm1156_vm0, %v1264_v49, %v1263_v48  ;;  %v1267_v53 = vrot.slane %v3209_v30, 7 }
 0x3ae   : > { %v1202_v57 = vmul.f32 1.442695, %v1201_v54  ;;  %v1206_v58 = vmul.f32 1.442695, %v1205_v3  ;;  %v1266_v3 = vsel %vm1159_vm2, %v3207_v29, %v1265_v50  ;;  %v1383_v50 = vstv %s1381_s13 }
 0x3af   : > { %v1268_v59 = vsel %vm1162_vm3, %v1267_v53, %v1266_v3  ;;  %vm1384_vm14 = vcmp.lt.s32.totalorder %v1383_v50, %v3237_v56 }
 0x3b0   : > { %2490 = vpow2.f32 %v1202_v57 }
 0x3b1   : > { %2492 = vpow2.f32 %v1206_v58  ;;  %v1269_v58 = vrot.slane %v3211_v32, 6 }
 0x3b3   : > { %v1270_v61 = vsel %vm1165_vm5, %v1269_v58, %v1268_v59 }
 0x3b7   : > { %v1239_v22 = vpop.permute.xlu1 %1238 }
 0x3b8   : > { %vm1240_vm15 = vcmp.eq.s32.totalorder %v1239_v22, 1 }
 0x3ba   : > { %v2491_v62 = vpop.eup %2490 }
 0x3bb   : > { %v1204_v63 = vadd.f32 1.0, %v2491_v62  ;;  %v2493_v4 = vpop.eup %2492  ;;  %v1273_v62 = vrot.slane %v3215_v36, 4 }
 0x3bd   : > { %v1208_v6 = vadd.f32 %v2493_v4, %v1204_v63  ;;  %v1272_v63 = vsel %vm1168_vm6, %v1271_v60, %v1270_v61 }
 0x3be   : > { %v1274_v4 = vsel %vm1171_vm7, %v1273_v62, %v1272_v63 }
 0x3bf   : > { %2494 = vlog2.f32 %v1208_v6  ;;  %v1276_v7 = vsel %vm1174_vm8, %v1275_v0, %v1274_v4 }
 0x3c9   : > { %v2495_v16 = vpop.eup %2494 }
 0x3ca   : > { %v1210_v19 = vmul.f32 0.6931472, %v2495_v16 }
 0x3cc   : > { %v1211_v21 = vadd.f32 %v1210_v19, %v1199_v52 }
 0x3ce   : > { %v1227_v27 = vadd.f32 %v1225_v20, %v1211_v21 }
 0x3d0   : > { %v1241_v28 = vsel %vm1240_vm15, %v1227_v27, %v1190_v44  ;;  %v1314_v27 = vrot.slane %v3203_v25, 3 }
 0x3d1   : > { %1245 = vrot.lane.b32.xlu1 %v1241_v28, %s2818_s12  ;;  %1242 = vrot.lane.b32.xlu0 %v1241_v28, %s2816_s28 }
 0x3d5   : > { %1289 = vperm.xlu0 %2483, %v1287_v1   ;;  %v1317_v1 = vrot.slane %v3207_v29, 1 }
 0x3d9   : > { %1340 = vperm.xlu0 %2483, %v1338_v31  }
 0x443   : > { %v1246_v34 = vpop.permute.xlu1 %1245  ;;  %v1243_v35 = vpop.permute.xlu0 %1242 }
 0x444   : > { %v1244_v38 = vsel %vm385_vm1, %v1243_v35, -1e+30  ;;  %v1247_v40 = vsel %vm3117_vm4, %v1246_v34, -1e+30 }
 0x445   : > { %v1248_v39 = vmax.f32 %v1241_v28, %v1244_v38  ;;  %v1249_v41 = vmin.f32 %v1241_v28, %v1244_v38 }
 0x447   : > { %v1250_v42 = vmax.f32 %v1248_v39, %v1247_v40  ;;  %v1251_v43 = vmin.f32 %v1248_v39, %v1247_v40 }
 0x449   : > { %v1252_v44 = vsub.f32 %v1251_v43, %v1250_v42  ;;  %v1256_v45 = vsub.f32 %v1249_v41, %v1250_v42  ;;  %v1320_v41 = vrot.slane %v3211_v32, 7  ;;  %v1322_v43 = vrot.slane %v3213_v33, 6 }
 0x44b   : > { %v1253_v46 = vmul.f32 1.442695, %v1252_v44  ;;  %v1257_v47 = vmul.f32 1.442695, %v1256_v45  ;;  %v1324_v45 = vrot.slane %v3215_v36, 5 }
 0x44d   : > { %2496 = vpow2.f32 %v1253_v46 }
 0x44e   : > { %2498 = vpow2.f32 %v1257_v47  ;;  %v1326_v47 = vrot.slane %v3217_v37, 4 }
 0x454   : > { %v1290_v9 = vpop.permute.xlu0 %1289 }
 0x455   : > { %vm1291_vm13 = vcmp.eq.s32.totalorder %v1290_v9, 1 }
 0x457   : > { %v2497_v51 = vpop.eup %2496 }
 0x458   : > { %v1255_v52 = vadd.f32 1.0, %v2497_v51  ;;  %v2499_v54 = vpop.eup %2498  ;;  %v1386_v51 = vstv %s1385_s14 }
 0x459   : > { %vm1387_vm15 = vcmp.eq.s32.totalorder %v1386_v51, 1 }
 0x45a   : > { %v1259_v57 = vadd.f32 %v2499_v54, %v1255_v52  ;;  %v1341_v54 = vpop.permute.xlu0 %1340  ;;  %vm1388_vm10 = vmand %vm1387_vm15, %vm1384_vm14 }
 0x45b   : > { %vm1342_vm9 = vcmp.eq.s32.totalorder %v1341_v54, 1  ;;  %v1389_v59 = vsel %vm1388_vm10, 1, %v2817_v55 }
 0x45c   : > { %2500 = vlog2.f32 %v1259_v57 }
 0x466   : > { %v2501_v5 = vpop.eup %2500 }
 0x467   : > { %v1261_v6 = vmul.f32 0.6931472, %v2501_v5 }
 0x469   : > { %v1262_v8 = vadd.f32 %v1261_v6, %v1250_v42 }
 0x46b   : > { %v1278_v11 = vadd.f32 %v1276_v7, %v1262_v8 }
 0x46d   : > { %v1292_v12 = vsel %vm1291_vm13, %v1278_v11, %v1241_v28  ;;  %v1315_v28 = vrot.slane %v3205_v26, 2 }
 0x46e   : > { %1293 = vrot.lane.b32.xlu1 %v1292_v12, %s2816_s28 }
 0x46f   : > { %v1316_v31 = vsel %vm1156_vm0, %v1315_v28, %v1314_v27  ;;  %v1375_v27 = vrot.slane %v3215_v36, 6 }
 0x470   : > { %v1318_v39 = vsel %vm1159_vm2, %v1317_v1, %v1316_v31  ;;  %v1377_v1 = vrot.slane %v3217_v37, 5 }
 0x471   : > { %v1319_v42 = vsel %vm1162_vm3, %v3209_v30, %v1318_v39 }
 0x472   : > { %1296 = vrot.lane.b32.xlu1 %v1292_v12, %s2818_s12  ;;  %v1321_v44 = vsel %vm1165_vm5, %v1320_v41, %v1319_v42 }
 0x473   : > { %v1323_v46 = vsel %vm1168_vm6, %v1322_v43, %v1321_v44 }
 0x474   : > { %v1325_v48 = vsel %vm1171_vm7, %v1324_v45, %v1323_v46 }
 0x475   : > { %v1327_v53 = vsel %vm1174_vm8, %v1326_v47, %v1325_v48 }
 0x4e0   : > { %v1294_v13 = vpop.permute.xlu1 %1293 }
 0x4e1   : > { %v1295_v14 = vsel %vm385_vm1, %v1294_v13, -1e+30  ;;  %v1366_v13 = vrot.slane %v3205_v26, 3 }
 0x4e2   : > { %v1299_v15 = vmax.f32 %v1292_v12, %v1295_v14  ;;  %v1300_v18 = vmin.f32 %v1292_v12, %v1295_v14  ;;  %v1368_v14 = vrot.slane %v3207_v29, 2 }
 0x4e4   : > { %v1297_v16 = vpop.permute.xlu1 %1296 }
 0x4e5   : > { %v1298_v17 = vsel %vm3117_vm4, %v1297_v16, -1e+30 }
 0x4e6   : > { %v1301_v19 = vmax.f32 %v1299_v15, %v1298_v17  ;;  %v1302_v20 = vmin.f32 %v1299_v15, %v1298_v17 }
 0x4e8   : > { %v1303_v21 = vsub.f32 %v1302_v20, %v1301_v19  ;;  %v1307_v22 = vsub.f32 %v1300_v18, %v1301_v19  ;;  %v1370_v18 = vrot.slane %v3209_v30, 1 }
 0x4ea   : > { %v1304_v23 = vmul.f32 1.442695, %v1303_v21  ;;  %v1308_v24 = vmul.f32 1.442695, %v1307_v22 }
 0x4ec   : > { %2502 = vpow2.f32 %v1304_v23  ;;  %v1373_v23 = vrot.slane %v3213_v33, 7 }
 0x4ed   : > { %2504 = vpow2.f32 %v1308_v24 }
 0x4f6   : > { %v2503_v34 = vpop.eup %2502 }
 0x4f7   : > { %v1306_v35 = vadd.f32 1.0, %v2503_v34  ;;  %v2505_v38 = vpop.eup %2504 }
 0x4f9   : > { %v1310_v40 = vadd.f32 %v2505_v38, %v1306_v35  ;;  %v1434_v35 = vstv %s1432_s10  ;;  %v1437_v38 = vstv %s1436_s16 }
 0x4fa   : > { %vm1435_vm11 = vcmp.lt.s32.totalorder %v1434_v35, %v3237_v56  ;;  %vm1438_vm12 = vcmp.eq.s32.totalorder %v1437_v38, 1 }
 0x4fb   : > { %2506 = vlog2.f32 %v1310_v40  ;;  %vm1439_vm14 = vmand %vm1438_vm12, %vm1435_vm11 }
 0x4fc   : > { %v1440_v45 = vsel %vm1439_vm14, 1, %v2817_v55 }
 0x505   : > { %v2507_v49 = vpop.eup %2506 }
 0x506   : > { %v1312_v52 = vmul.f32 0.6931472, %v2507_v49 }
 0x508   : > { %v1313_v3 = vadd.f32 %v1312_v52, %v1301_v19 }
 0x50a   : > { %v1329_v57 = vadd.f32 %v1327_v53, %v1313_v3 }
 0x50c   : > { %v1343_v58 = vsel %vm1342_vm9, %v1329_v57, %v1292_v12  ;;  %v1365_v12 = vrot.slane %v3203_v25, 4 }
 0x50d   : > { %1347 = vrot.lane.b32.xlu0 %v1343_v58, %s2818_s12  ;;  %1344 = vrot.lane.b32.xlu1 %v1343_v58, %s2816_s28 }
 0x50e   : > { %v1367_v15 = vsel %vm1156_vm0, %v1366_v13, %v1365_v12  ;;  %v1426_v12 = vrot.slane %v3215_v36, 7 }
 0x50f   : > { %v1369_v20 = vsel %vm1159_vm2, %v1368_v14, %v1367_v15  ;;  %v1428_v14 = vrot.slane %v3217_v37, 6 }
 0x510   : > { %v1371_v22 = vsel %vm1162_vm3, %v1370_v18, %v1369_v20  ;;  %v1488_v18 = vstv %s1487_s9 }
 0x511   : > { %1391 = vperm.xlu1 %2482, %v1389_v59   ;;  %v1372_v24 = vsel %vm1165_vm5, %v3211_v32, %v1371_v22  ;;  %v1416_v59 = vrot.slane %v3203_v25, 5  ;;  %vm1489_vm9 = vcmp.eq.s32.totalorder %v1488_v18, 1 }
 0x512   : > { %v1374_v28 = vsel %vm1168_vm6, %v1373_v23, %v1372_v24 }
 0x513   : > { %v1376_v31 = vsel %vm1171_vm7, %v1375_v27, %v1374_v28 }
 0x514   : > { %v1378_v40 = vsel %vm1174_vm8, %v1377_v1, %v1376_v31 }
 0x57f   : > { %v1348_v60 = vpop.permute.xlu0 %1347  ;;  %v1345_v61 = vpop.permute.xlu1 %1344 }
 0x580   : > { %v1346_v62 = vsel %vm385_vm1, %v1345_v61, -1e+30  ;;  %v1349_v0 = vsel %vm3117_vm4, %v1348_v60, -1e+30  ;;  %v1417_v60 = vrot.slane %v3205_v26, 4  ;;  %v1419_v61 = vrot.slane %v3207_v29, 3 }
 0x581   : > { %v1350_v63 = vmax.f32 %v1343_v58, %v1346_v62  ;;  %v1351_v4 = vmin.f32 %v1343_v58, %v1346_v62 }
 0x582   : > { %v1418_v62 = vsel %vm1156_vm0, %v1417_v60, %v1416_v59 }
 0x583   : > { %v1352_v5 = vmax.f32 %v1350_v63, %v1349_v0  ;;  %v1353_v6 = vmin.f32 %v1350_v63, %v1349_v0 }
 0x585   : > { %v1354_v7 = vsub.f32 %v1353_v6, %v1352_v5  ;;  %v1358_v8 = vsub.f32 %v1351_v4, %v1352_v5  ;;  %v1421_v4 = vrot.slane %v3209_v30, 2  ;;  %v1420_v6 = vsel %vm1159_vm2, %v1419_v61, %v1418_v62 }
 0x586   : > { %v1479_v61 = vrot.slane %v3217_v37, 7 }
 0x587   : > { %v1355_v9 = vmul.f32 1.442695, %v1354_v7  ;;  %v1359_v11 = vmul.f32 1.442695, %v1358_v8  ;;  %v1423_v8 = vrot.slane %v3211_v32, 1 }
 0x589   : > { %2508 = vpow2.f32 %v1355_v9  ;;  %v1422_v9 = vsel %vm1162_vm3, %v1421_v4, %v1420_v6  ;;  %v1539_v4 = vstv %s1538_s20 }
 0x58a   : > { %2510 = vpow2.f32 %v1359_v11  ;;  %v1424_v11 = vsel %vm1165_vm5, %v1423_v8, %v1422_v9 }
 0x58b   : > { %v1425_v13 = vsel %vm1168_vm6, %v3213_v33, %v1424_v11 }
 0x58c   : > { %v1427_v15 = vsel %vm1171_vm7, %v1426_v12, %v1425_v13 }
 0x58d   : > { %v1429_v20 = vsel %vm1174_vm8, %v1428_v14, %v1427_v15 }
 0x590   : > { %v1392_v42 = vpop.permute.xlu1 %1391 }
 0x591   : > { %vm1393_vm13 = vcmp.eq.s32.totalorder %v1392_v42, 1 }
 0x593   : > { %v2509_v16 = vpop.eup %2508 }
 0x594   : > { %v1357_v17 = vadd.f32 1.0, %v2509_v16  ;;  %v2511_v19 = vpop.eup %2510 }
 0x596   : > { %v1361_v21 = vadd.f32 %v2511_v19, %v1357_v17  ;;  %v1485_v17 = vstv %s1483_s18 }
 0x597   : > { %vm1486_vm15 = vcmp.lt.s32.totalorder %v1485_v17, %v3237_v56 }
 0x598   : > { %2512 = vlog2.f32 %v1361_v21  ;;  %vm1490_vm11 = vmand %vm1489_vm9, %vm1486_vm15  ;;  %vm1594_vm9 = vcmask (!%p1745_p10), 7168  }
 0x599   : > { %v1491_v27 = vsel %vm1490_vm11, 1, %v2817_v55 }
 0x5a2   : > { %v2513_v34 = vpop.eup %2512 }
 0x5a3   : > { %v1363_v39 = vmul.f32 0.6931472, %v2513_v34 }
 0x5a5   : > { %v1364_v41 = vadd.f32 %v1363_v39, %v1352_v5 }
 0x5a7   : > { %v1380_v43 = vadd.f32 %v1378_v40, %v1364_v41 }
 0x5a9   : > { %v1394_v44 = vsel %vm1393_vm13, %v1380_v43, %v1343_v58  ;;  %vm1540_vm13 = vcmp.eq.s32.totalorder %v1539_v4, 1 }
 0x5aa   : > { %1398 = vrot.lane.b32.xlu1 %v1394_v44, %s2818_s12  ;;  %1395 = vrot.lane.b32.xlu0 %v1394_v44, %s2816_s28 }
 0x5ae   : > { %1442 = vperm.xlu0 %2483, %v1440_v45   ;;  %v1467_v45 = vrot.slane %v3203_v25, 6 }
 0x61c   : > { %v1399_v46 = vpop.permute.xlu1 %1398  ;;  %v1396_v47 = vpop.permute.xlu0 %1395 }
 0x61d   : > { %v1397_v48 = vsel %vm385_vm1, %v1396_v47, -1e+30  ;;  %v1400_v50 = vsel %vm3117_vm4, %v1399_v46, -1e+30  ;;  %v1468_v46 = vrot.slane %v3205_v26, 5  ;;  %v1470_v47 = vrot.slane %v3207_v29, 4 }
 0x61e   : > { %v1401_v49 = vmax.f32 %v1394_v44, %v1397_v48  ;;  %v1402_v51 = vmin.f32 %v1394_v44, %v1397_v48 }
 0x61f   : > { %v1469_v48 = vsel %vm1156_vm0, %v1468_v46, %v1467_v45 }
 0x620   : > { %v1403_v52 = vmax.f32 %v1401_v49, %v1400_v50  ;;  %v1404_v53 = vmin.f32 %v1401_v49, %v1400_v50 }
 0x622   : > { %v1405_v54 = vsub.f32 %v1404_v53, %v1403_v52  ;;  %v1409_v3 = vsub.f32 %v1402_v51, %v1403_v52  ;;  %v1472_v51 = vrot.slane %v3209_v30, 3  ;;  %v1471_v53 = vsel %vm1159_vm2, %v1470_v47, %v1469_v48 }
 0x624   : > { %v1406_v57 = vmul.f32 1.442695, %v1405_v54  ;;  %v1410_v58 = vmul.f32 1.442695, %v1409_v3  ;;  %v1474_v3 = vrot.slane %v3211_v32, 2 }
 0x626   : > { %2514 = vpow2.f32 %v1406_v57  ;;  %v1473_v57 = vsel %vm1162_vm3, %v1472_v51, %v1471_v53 }
 0x627   : > { %2516 = vpow2.f32 %v1410_v58  ;;  %v1476_v58 = vrot.slane %v3213_v33, 1  ;;  %v1475_v59 = vsel %vm1165_vm5, %v1474_v3, %v1473_v57 }
 0x629   : > { %v1477_v60 = vsel %vm1168_vm6, %v1476_v58, %v1475_v59 }
 0x62a   : > { %v1478_v62 = vsel %vm1171_vm7, %v3215_v36, %v1477_v60 }
 0x62b   : > { %v1480_v6 = vsel %vm1174_vm8, %v1479_v61, %v1478_v62 }
 0x62d   : > { %v1443_v22 = vpop.permute.xlu0 %1442 }
 0x62e   : > { %vm1444_vm10 = vcmp.eq.s32.totalorder %v1443_v22, 1 }
 0x630   : > { %v2515_v63 = vpop.eup %2514 }
 0x631   : > { %v1408_v0 = vadd.f32 1.0, %v2515_v63  ;;  %v2517_v5 = vpop.eup %2516 }
 0x633   : > { %v1412_v7 = vadd.f32 %v2517_v5, %v1408_v0  ;;  %v1536_v0 = vstv %s1534_s30 }
 0x634   : > { %vm1537_vm12 = vcmp.lt.s32.totalorder %v1536_v0, %v3237_v56 }
 0x635   : > { %2518 = vlog2.f32 %v1412_v7  ;;  %vm1541_vm15 = vmand %vm1540_vm13, %vm1537_vm12 }
 0x636   : > { %v1542_v12 = vsel %vm1541_vm15, 1, %v2817_v55  ;;  %v1518_v55 = vrot.slane %v3203_v25, 7  ;;  %v1527_v25 = vrot.slane %v3213_v33, 2  ;;  %v1553_v33 = vld [vmem:[#allocation11] sm:$0xff] (!%p1745_p10) }
 0x637   : > { %v1554_v48 = vmul.u32 (!%p1745_p10), 2, %v1553_v33 }
 0x63f   : > { %v2519_v16 = vpop.eup %2518 }
 0x640   : > { %v1414_v19 = vmul.f32 0.6931472, %v2519_v16 }
 0x642   : > { %v1415_v21 = vadd.f32 %v1414_v19, %v1403_v52 }
 0x644   : > { %v1431_v23 = vadd.f32 %v1429_v20, %v1415_v21 }
 0x646   : > { %v1445_v24 = vsel %vm1444_vm10, %v1431_v23, %v1394_v44 }
 0x647   : > { %1449 = vrot.lane.b32.xlu0 %v1445_v24, %s2818_s12  ;;  %1446 = vrot.lane.b32.xlu1 %v1445_v24, %s2816_s28 }
 0x64b   : > { %1493 = vperm.xlu1 %2482, %v1491_v27   ;;  %v1521_v27 = vrot.slane %v3207_v29, 5  ;;  %v1529_v29 = vrot.slane %v3215_v36, 1  ;;  %v2819_v36 = vmov (!%p1745_p10), 0  }
 0x64f   : > { %2533 = vset.pattern.permute.xlu1 (!%p1745_p10), %v2819_v36 }
 0x6b9   : > { %v1450_v28 = vpop.permute.xlu0 %1449  ;;  %v1447_v1 = vpop.permute.xlu1 %1446 }
 0x6ba   : > { %v1448_v31 = vsel %vm385_vm1, %v1447_v1, -1e+30  ;;  %v1451_v35 = vsel %vm3117_vm4, %v1450_v28, -1e+30 }
 0x6bb   : > { %v1452_v34 = vmax.f32 %v1445_v24, %v1448_v31  ;;  %v1453_v38 = vmin.f32 %v1445_v24, %v1448_v31  ;;  %v1523_v31 = vrot.slane %v3209_v30, 4 }
 0x6bd   : > { %v1454_v39 = vmax.f32 %v1452_v34, %v1451_v35  ;;  %v1455_v40 = vmin.f32 %v1452_v34, %v1451_v35 }
 0x6bf   : > { %v1456_v41 = vsub.f32 %v1455_v40, %v1454_v39  ;;  %v1460_v42 = vsub.f32 %v1453_v38, %v1454_v39 }
 0x6c1   : > { %v1457_v43 = vmul.f32 1.442695, %v1456_v41  ;;  %v1461_v44 = vmul.f32 1.442695, %v1460_v42 }
 0x6c3   : > { %2520 = vpow2.f32 %v1457_v43 }
 0x6c4   : > { %2522 = vpow2.f32 %v1461_v44 }
 0x6ca   : > { %v1494_v8 = vpop.permute.xlu1 %1493 }
 0x6cb   : > { %vm1495_vm14 = vcmp.eq.s32.totalorder %v1494_v8, 1 }
 0x6cd   : > { %v2521_v49 = vpop.eup %2520 }
 0x6ce   : > { %v1459_v50 = vadd.f32 1.0, %v2521_v49  ;;  %v2523_v52 = vpop.eup %2522  ;;  %v1555_v49 = vadd.s32 (!%p1745_p10), 1, %v1554_v48 }
 0x6d0   : > { %v1463_v54 = vadd.f32 %v2523_v52, %v1459_v50  ;;  %v1746_v50 = vadd.s32 (!%p1745_p10), 4294967294, %v1555_v49 }
 0x6d2   : > { %2524 = vlog2.f32 %v1463_v54 }
 0x6dc   : > { %v2525_v63 = vpop.eup %2524 }
 0x6dd   : > { %v1465_v5 = vmul.f32 0.6931472, %v2525_v63 }
 0x6df   : > { %v1466_v7 = vadd.f32 %v1465_v5, %v1454_v39  ;;  %v1525_v39 = vrot.slane %v3211_v32, 3 }
 0x6e1   : > { %v1482_v9 = vadd.f32 %v1480_v6, %v1466_v7  ;;  %v1592_v6 = vld [vmem:[#allocation12] sm:$0xff] (!%p1745_p10) }
 0x6e3   : > { %v1496_v11 = vsel %vm1495_vm14, %v1482_v9, %v1445_v24  ;;  %v1519_v24 = vrot.slane %v3205_v26, 6 }
 0x6e4   : > { %1500 = vrot.lane.b32.xlu1 %v1496_v11, %s2818_s12  ;;  %1497 = vrot.lane.b32.xlu0 %v1496_v11, %s2816_s28 }
 0x6e5   : > { %v1520_v28 = vsel %vm1156_vm0, %v1519_v24, %v1518_v55 }
 0x6e6   : > { %v1522_v35 = vsel %vm1159_vm2, %v1521_v27, %v1520_v28 }
 0x6e7   : > { %v1524_v40 = vsel %vm1162_vm3, %v1523_v31, %v1522_v35 }
 0x6e8   : > { %1544 = vperm.xlu0 %2483, %v1542_v12   ;;  %v1526_v26 = vsel %vm1165_vm5, %v1525_v39, %v1524_v40  ;;  %1557 = vperm.xlu1 (!%p1745_p10), %2533, %v1554_v48  }
 0x6e9   : > { %v1528_v41 = vsel %vm1168_vm6, %v1527_v25, %v1526_v26 }
 0x6ea   : > { %v1530_v42 = vsel %vm1171_vm7, %v1529_v29, %v1528_v41  ;;  %vm1587_vm7 = vcmp.gt.s32.totalorder (!%p1745_p10), %v1553_v33, 1 }
 0x6eb   : > { %v1531_v44 = vsel %vm1174_vm8, %v3217_v37, %v1530_v42  ;;  %v1588_v60 = vsel (!%p1745_p10), %vm1587_vm7, %v1553_v33, 1 }
 0x6ec   : > { %2532 = vset.pattern.permute.xlu0 (!%p1745_p10), %v2819_v36  ;;  %v1589_v62 = vcvt.s32.f32 (!%p1745_p10), %v1588_v60 }
 0x6ed   : > { %1562 = vperm.xlu0 (!%p1745_p10), %2532, %v1746_v50  }
 0x756   : > { %v1501_v13 = vpop.permute.xlu1 %1500  ;;  %v1498_v14 = vpop.permute.xlu0 %1497 }
 0x757   : > { %v1499_v15 = vsel %vm385_vm1, %v1498_v14, -1e+30  ;;  %v1502_v56 = vsel %vm3117_vm4, %v1501_v13, -1e+30  ;;  %vm1565_vm4 = vcmp.ge.s32.totalorder (!%p1745_p10), %v1553_v33, 1 }
 0x758   : > { %v1503_v16 = vmax.f32 %v1496_v11, %v1499_v15  ;;  %v1504_v17 = vmin.f32 %v1496_v11, %v1499_v15  ;;  %v1566_v37 = vsel (!%p1745_p10), %vm1565_vm4, 1, %v2819_v36 }
 0x759   : > { %1568 = vperm.xlu0 (!%p1745_p10), %2532, %v1566_v37  }
 0x75a   : > { %v1505_v18 = vmax.f32 %v1503_v16, %v1502_v56  ;;  %v1506_v19 = vmin.f32 %v1503_v16, %v1502_v56 }
 0x75c   : > { %v1507_v20 = vsub.f32 %v1506_v19, %v1505_v18  ;;  %v1511_v21 = vsub.f32 %v1504_v17, %v1505_v18 }
 0x75e   : > { %v1508_v22 = vmul.f32 1.442695, %v1507_v20  ;;  %v1512_v23 = vmul.f32 1.442695, %v1511_v21 }
 0x760   : > { %2526 = vpow2.f32 %v1508_v22 }
 0x761   : > { %2528 = vpow2.f32 %v1512_v23 }
 0x767   : > { %v1545_v32 = vpop.permute.xlu0 %1544  ;;  %v1558_v52 = vpop.permute.xlu1 (!%p1745_p10), %1557 }
 0x768   : > { %vm1546_vm1 = vcmp.eq.s32.totalorder %v1545_v32, 1  ;;  %vm1559_vm0 = vcmp.eq.s32.totalorder (!%p1745_p10), %v3109_v2, %v1558_v52 }
 0x76a   : > { %v2527_v1 = vpop.eup %2526 }
 0x76b   : > { %v1510_v10 = vadd.f32 1.0, %v2527_v1  ;;  %v2529_v34 = vpop.eup %2528 }
 0x76c   : > { %v1563_v51 = vpop.permute.xlu0 (!%p1745_p10), %1562 }
 0x76d   : > { %v1514_v38 = vadd.f32 %v2529_v34, %v1510_v10  ;;  %vm1564_vm2 = vcmp.eq.s32.totalorder (!%p1745_p10), %v3109_v2, %v1563_v51 }
 0x76f   : > { %2530 = vlog2.f32 %v1514_v38 }
 0x779   : > { %v2531_v30 = vpop.eup %2530 }
 0x77a   : > { %v1516_v43 = vmul.f32 0.6931472, %v2531_v30 }
 0x77b   : > { %1552 = sbr.rel (%p1745_p10) target bundleno = 2336 (0x920), region = 76 }
 0x77c   : > { %v1517_v45 = vadd.f32 %v1516_v43, %v1505_v18 }
 0x77e   : > { %v1533_v46 = vadd.f32 %v1531_v44, %v1517_v45 }
 0x780   : > { %v1547_v47 = vsel %vm1546_vm1, %v1533_v46, %v1496_v11 }
 0x781   : > { %1548 = vst [vmem:[#allocation2] sm:$0xff] %v1547_v47 }
 0x7d8   : > { %v1569_v53 = vpop.permute.xlu0 %1568 }
 0x7d9   : > { %vm1570_vm3 = vcmp.eq.s32.totalorder %v1569_v53, 1 }
 0x7da   : > { %vm1571_vm5 = vmand %vm1564_vm2, %vm1570_vm3 }
 0x7db   : > { %vm1572_vm6 = vmor %vm1559_vm0, %vm1571_vm5 }
 0x7dc   : > { %v1573_v54 = vsel %vm1572_vm6, %v1547_v47, -1e+30 }
 0x7dd   : > { %1574 = vmax.xlane.f32.xlu1 %v1573_v54 }
 0x86a   : > { %v1575_v3 = vpop.xlane.xlu1 %1574 }
 0x86b   : > { %v1576_v57 = vsub.f32 %v1573_v54, %v1575_v3 }
 0x86d   : > { %v1577_v58 = vmul.f32 1.442695, %v1576_v57 }
 0x86f   : > { %2534 = vpow2.f32 %v1577_v58 }
 0x879   : > { %v2535_v59 = vpop.eup %2534 }
 0x87a   : > { %1579 = vadd.xlane.f32.xlu0 %v2535_v59 }
 0x907   : > { %v1580_v61 = vpop.xlane.xlu0 %1579 }
 0x908   : > { %2536 = vlog2.f32 %v1580_v61 }
 0x909   : > { %2538 = vrcp.f32 %v1589_v62 }
 0x912   : > { %v2537_v63 = vpop.eup %2536 }
 0x913   : > { %v1582_v0 = vmul.f32 0.6931472, %v2537_v63  ;;  %v2539_v5 = vpop.eup %2538 }
 0x915   : > { %v1583_v2 = vadd.f32 %v1582_v0, %v1575_v3 }
 0x917   : > { %v1584_v4 = vsub.f32 0.0, %v1583_v2 }
 0x919   : > { %vm1585_vm8 = vcmp.gt.f32.partialorder %v1584_v4, 1e+29 }
 0x91a   : > { %v1586_v7 = vsel %vm1585_vm8, 0.0, %v1584_v4 }
 0x91b   : > { %v1591_v8 = vmul.f32 %v2539_v5, %v1586_v7 }
 0x91d   : > { %v1593_v9 = vmul.f32 %v1592_v6, %v1591_v8 }
 0x91f   : > { %1595 = vst.msk [vmem:[#allocation14] sm:$0xff] %vm1594_vm9, %v1593_v9 }
 0x920 PF: > { %s3517_s24 = sadd.s32 4294967295, %s2802_s26   ;;  %s2820_s29 = smov [#allocation14]  }
 0x921   : > { %p3447_p1 = scmp.eq.s32.totalorder %s3517_s24, 1  ;;  %s1605_s12 = sshll.u32 %s2820_s29, 4  ;;  %s1606_s12 = int_to_ptr.vmem [resolvable:$true] %s1605_s12 }
 0x922   : > { %s2710_s8 = scalar_lea.vmem %s1606_s12, 128  ;;  %p2717_p7 = scmp.lt.s32.totalorder %s1606_s12, %s1606_s12 }
 0x923   : > { %p2711_p3 = scmp.ne.s32.totalorder %s1606_s12, %s2710_s8  ;;  %p2718_p9 = scmp.lt.s32.totalorder %s2710_s8, %s2710_s8 }
 0x925   : > { %p2712_p8 = pnand %p2711_p3, %p3447_p1  ;;  %p2719_p4 = por %p2718_p9, %p2717_p7 }
 0x927   : > { %p2713_p11 = pneg %p2712_p8 }
 0x929   : > { %p2720_p5 = pnand %p2719_p4, %p2713_p11 }
 0x92b   : > { %2723 = shalt.err (!%p2720_p5)
}
 0x92c   : > { %s2724_s21 = scalar_lea.hbm %s3497_s6, 128 }
 0x92d   : > { %p2725_p12 = scmp.ne.s32.totalorder %s3497_s6, %s2724_s21  ;;  %p2730_p2 = scmp.lt.u32.totalorder %s2724_s21, %s3497_s6 }
 0x92f   : > { %p2726_p13 = pnand %p2725_p12, %p3447_p1 }
 0x931   : > { %p2727_p0 = pneg %p2726_p13 }
 0x933   : > { %p2732_p6 = pnand %p2730_p2, %p2727_p0 }
 0x935   : > { %2735 = shalt.err (!%p2732_p6)
}
 0x936   : > { %2382 = dma.vmem_to_hbm [thread:$0]  (%p3447_p1), %s1606_s12, 128, %s3497_s6, [#allocation5]  }
 0x937   : > { %2777 = dma.done.wait (%p3447_p1), [#allocation5], 128  }
 0x938   : > { %2779 = vsyncadd (%p3447_p1), [#allocation5], 4294967168 }
 0x939 PF: > { %s23_s26 = sadd.s32 1, %s2802_s26   ;;  %s3519_s21 = smov %s2786_s22 }
 0x93a   : > { %p20_p10 = scmp.ge.s32.totalorder %s23_s26, 4   ;;  %s3520_s22 = smov %s2790_s23 }
 0x93b   : > { %s3521_s23 = smov %s3041_s17  ;;  %s3522_s24 = smov %s2798_s25 }
 0x93c   : > { %s3523_s25 = smov %s3525_s27  ;;  %22 = sbr.rel (!%p20_p10) target bundleno = 8 (0x8), region = 115 }
 0x943   :  { %1618 = vsyncpa [#allocation4], 1 }
 0x944   :  { %1620 = vsyncpa [#allocation4 + $0x1], 1 }
 0x945   :  { %1621 = vsyncpa [#allocation7], 1 }
 0x946   :  { %1622 = vsyncpa [#allocation10], 1 }
 0x947   :  { %1623 = vsyncpa [#allocation13], 1 }
 0x948   :  { %1624 = vsyncpa [#allocation5], 1 }
 0x949   :  { %1626 = vsyncpa [#allocation5 + $0x1], 1 }

</bundles_post_ra>
